<compile_context>
chip_gen: v5e
topology: v5e:2x2
jax: 0.10.0
libtpu: 0.0.40
codegen_flags: <defaults>
</compile_context>

<pallas_src>
import math
import functools

import jax
import jax.numpy as jnp
import numpy as np
from jax.experimental import pallas as pl
from jax.experimental.pallas import tpu as pltpu

LN_EPS = 1e-5


# ----------------------------- small helpers ---------------------------------
def _round_up(n, m):
    return ((n + m - 1) // m) * m


def _layernorm(z, w, b, d_real):
    """LayerNorm over the (lane-padded) last axis.

    Padded lanes hold exact zeros, so sums over the padded width divided by the
    *real* width give the correct mean / E[x^2]; padded w/b are zero so the
    padded output lanes stay exactly zero.
    """
    inv_d = 1.0 / float(d_real)
    mu = jnp.sum(z, axis=-1, keepdims=True) * inv_d
    msq = jnp.sum(z * z, axis=-1, keepdims=True) * inv_d
    var = jnp.maximum(msq - mu * mu, 0.0)
    return (z - mu) * jax.lax.rsqrt(var + LN_EPS) * w + b


def _estimate_vmem_bytes(m_rows, d_real, d_pad, hf_pad, s, h, d_out_pad):
    """Rough per-tile VMEM footprint (activations + double-buffered weights)."""
    act = 0
    act += m_rows * d_pad * 4                      # x_scr (f32)
    act += 2 * m_rows * d_pad * 2                  # double-buffered bf16 x block
    act += m_rows * 3 * d_pad * (4 + 2)            # qkv f32 + bf16 q/k/v
    act += 3 * m_rows * d_real * 2                 # qh/kh/vh
    act += 3 * h * m_rows * s * 4                  # logits / exp / probs
    act += m_rows * d_real * (4 + 2)               # attention output / concat
    act += 3 * m_rows * d_pad * 4                  # LN / residual temporaries
    act += m_rows * 2 * hf_pad * 4 + m_rows * hf_pad * 2   # h1 / h_act
    w_layer = (d_pad * 3 * d_pad + d_real * d_pad +
               d_pad * 2 * hf_pad + hf_pad * d_pad) * 2    # bf16 matrices
    w_layer += (3 * d_pad + 6 * d_pad + 2 * hf_pad) * 4    # biases / LN params
    head = (d_pad * d_out_pad + d_out_pad + 2 * d_pad) * 4
    head += max(m_rows // max(s, 1), 1) * d_out_pad * 4
    return act + 2 * w_layer + head


def _choose_batch_tile(B, S, d_real, d_pad, hf_pad, h, d_out_pad):
    """Generation-aware batch tile: feed the MXU (>=~1024 rows/tile), keep >=2
    tiles on the batch grid axis when B allows (v7x has 2 TensorCores), and cap
    by a VMEM estimate (v7x: 64 MiB/TC physical)."""
    cands = sorted({c for c in range(8, B, 8) if B % c == 0} | {B})
    target_rows = 1024
    budget = 40 * 2 ** 20
    pick = None
    for c in cands:
        if c * S >= target_rows:
            pick = c
            break
    if pick is None:
        pick = B
    while _estimate_vmem_bytes(pick * S, d_real, d_pad, hf_pad, S, h, d_out_pad) > budget:
        smaller = [c for c in cands if c < pick]
        if not smaller:
            break
        pick = smaller[-1]
    return pick


# ----------------------------- fused Pallas kernel ---------------------------
def _fused_transformer_kernel(
        # inputs (order must match in_specs in the wrapper)
        x_ref,                                  # (TB*S, Dp)           bf16
        lnA_w_ref, lnA_b_ref,                   # (1, 1, Dp)           f32
        wqkv_ref, bqkv_ref,                     # (1, Dp, 3*Dp) bf16 / (1, 1, 3*Dp) f32
        wo_ref, bo_ref,                         # (1, D, Dp)    bf16 / (1, 1, Dp)   f32
        lnF_w_ref, lnF_b_ref,                   # (1, 1, Dp)           f32
        w1_ref, b1_ref,                         # (1, Dp, 2*Hfp) bf16 / (1, 1, 2*Hfp) f32
        w2_ref, b2_ref,                         # (1, Hfp, Dp)  bf16 / (1, 1, Dp)     f32
        hln_w_ref, hln_b_ref,                   # (1, Dp)              f32
        hw_ref, hb_ref,                         # (Dp, DOUT_PAD) f32 / (1, DOUT_PAD) f32
        # outputs
        out_ref,                                # (TB, DOUT_PAD)       f32
        # scratch
        x_scr,                                  # VMEM (TB*S, Dp)      f32
        *, n_heads, n_tokens, batch_tile, d_model, scale):
    layer = pl.program_id(1)
    n_layers = pl.num_programs(1)
    TB, S, H, D = batch_tile, n_tokens, n_heads, d_model
    M = TB * S
    Dp = x_ref.shape[-1]
    dh = D // H
    Hfp = w2_ref.shape[1]
    bf16 = jnp.bfloat16

    # Load activations once per batch tile (bf16 DMA); stay VMEM-resident across
    # the whole layer stack.
    @pl.when(layer == 0)
    def _load_x():
        x_scr[...] = x_ref[...].astype(jnp.float32)

    x = x_scr[...]                                          # (M, Dp) f32

    # ------------------- attention residual branch (pre-norm) ------------------
    # prenormalization=True, first_prenormalization=False: block 0 carries no
    # attention LayerNorm; the LN is cheap VPU work, so compute it and select.
    ln_x = _layernorm(x, lnA_w_ref[0], lnA_b_ref[0], D)
    x_res = jnp.where(layer > 0, ln_x, x)
    xb = x_res.astype(bf16)

    # Fused Q/K/V projection: ONE wide MXU matmul (bf16 in, f32 accumulate);
    # the splits below are 128-aligned lane slices (Dp is a multiple of 128).
    qkv = jnp.dot(xb, wqkv_ref[0], preferred_element_type=jnp.float32) + bqkv_ref[0]
    q = qkv[:, :Dp].astype(bf16)
    k = qkv[:, Dp:2 * Dp].astype(bf16)
    v = qkv[:, 2 * Dp:].astype(bf16)

    # Head split on bf16 data (half the bytes moved by the layout copies).
    # TODO(synk): dh-wide lane slices are still sub-128 masked copies; a
    # pltpu.einshape '(ts)(hd)->(ht)sd' rewrite would remove them entirely.
    def split_heads(t):                                     # (M, Dp) -> (H*TB, S, dh)
        parts = [t[:, h * dh:(h + 1) * dh].reshape(TB, S, dh) for h in range(H)]
        return jnp.concatenate(parts, axis=0)

    qh, kh, vh = split_heads(q), split_heads(k), split_heads(v)

    # Attention core: two batched 3-D contractions over the folded (head*batch)
    # leading dim; softmax with EUP approx reciprocal.  Non-flash: logits
    # materialize (H*TB, S, S) — fine for tabular token counts.
    logits = jnp.einsum('bqd,bkd->bqk', qh, kh,
                        preferred_element_type=jnp.float32) * scale
    m = jnp.max(logits, axis=-1, keepdims=True)
    e = jnp.exp(logits - m)
    probs = e * pl.reciprocal(jnp.sum(e, axis=-1, keepdims=True), approx=True)
    o = jnp.einsum('bqk,bkd->bqd', probs.astype(bf16), vh,
                   preferred_element_type=jnp.float32)       # (H*TB, S, dh) f32

    o = o.astype(bf16).reshape(H, M, dh)                     # bf16 before the merge
    attn_cat = jnp.concatenate([o[h] for h in range(H)], axis=-1)   # (M, D), head-major
    attn = jnp.dot(attn_cat, wo_ref[0],
                   preferred_element_type=jnp.float32) + bo_ref[0]   # (M, Dp)
    x = x + attn                                   # residual (residual_dropout == 0)

    # ----------------------- FFN residual branch (ReGLU) -----------------------
    x_res = _layernorm(x, lnF_w_ref[0], lnF_b_ref[0], D)
    h1 = jnp.dot(x_res.astype(bf16), w1_ref[0],
                 preferred_element_type=jnp.float32) + b1_ref[0]     # (M, 2*Hfp)
    # w1 columns are [value | gate], each half padded to a 128 multiple, so both
    # slices below are lane-aligned; padded lanes are exact zeros.
    h_act = (h1[:, :Hfp] * jnp.maximum(h1[:, Hfp:], 0.0)).astype(bf16)   # ReGLU
    ffn = jnp.dot(h_act, w2_ref[0],
                  preferred_element_type=jnp.float32) + b2_ref[0]
    x = x + ffn

    x_scr[...] = x                                 # stays resident for the next layer

    # -------------------- head epilogue (BERT-like, last token) ----------------
    @pl.when(layer == n_layers - 1)
    def _head():
        z = x.reshape(TB, S, Dp)[:, S - 1, :]       # x[:, -1] -> (TB, Dp)
        z = _layernorm(z, hln_w_ref[...], hln_b_ref[...], D)
        z = jnp.maximum(z, 0.0)                     # head_activation = ReLU
        out_ref[...] = jnp.dot(z, hw_ref[...],
                               preferred_element_type=jnp.float32) + hb_ref[...]


# ----------------------------- wrapper ----------------------------------------
def transformer_forward(x, block_params, head_params, *, n_heads, batch_tile=None):
    B, S, D = x.shape
    n_blocks = len(block_params)
    assert D % n_heads == 0
    dh = D // n_heads
    f32, bf16 = jnp.float32, jnp.bfloat16

    # Lane padding: token width and FFN hidden width to multiples of 128.
    Dp = _round_up(D, 128)
    Hf = block_params[0]['w2'].shape[0]
    for p in block_params:
        # ReGLU layout guard: w1 = [value | gate], consistent with w2's input width.
        assert p['w1'].shape == (D, 2 * Hf) and p['w2'].shape == (Hf, D), \
            'ReGLU layout must be w1: (D, 2*d_hidden) = [value|gate], w2: (d_hidden, D)'
    Hfp = _round_up(Hf, 128)
    d_out = head_params['w'].shape[1]
    d_out_pad = _round_up(d_out, 128)

    if batch_tile is None:
        batch_tile = _choose_batch_tile(B, S, D, Dp, Hfp, n_heads, d_out_pad)
    assert B % batch_tile == 0
    assert batch_tile == B or batch_tile % 8 == 0

    def pad2(w, rows, cols):
        return jnp.pad(w, ((0, rows - w.shape[0]), (0, cols - w.shape[1])))

    def pad1(b, n):
        return jnp.pad(b, (0, n - b.shape[0]))

    # --- stacked per-layer parameters (leading layer axis; matmul weights bf16,
    #     biases / LN params f32; everything zero-padded to lane-dense widths) ---
    lnA_w = jnp.stack([pad1(p['lnA_w'], Dp) for p in block_params])[:, None, :]
    lnA_b = jnp.stack([pad1(p['lnA_b'], Dp) for p in block_params])[:, None, :]
    wqkv = jnp.stack([
        jnp.concatenate([pad2(p['wq'], Dp, Dp), pad2(p['wk'], Dp, Dp),
                         pad2(p['wv'], Dp, Dp)], axis=1)
        for p in block_params]).astype(bf16)                                   # (L, Dp, 3Dp)
    bqkv = jnp.stack([
        jnp.concatenate([pad1(p['bq'], Dp), pad1(p['bk'], Dp), pad1(p['bv'], Dp)])
        for p in block_params])[:, None, :]                                    # (L, 1, 3Dp)
    wo = jnp.stack([pad2(p['wo'], D, Dp) for p in block_params]).astype(bf16)  # (L, D, Dp)
    bo = jnp.stack([pad1(p['bo'], Dp) for p in block_params])[:, None, :]
    lnF_w = jnp.stack([pad1(p['lnF_w'], Dp) for p in block_params])[:, None, :]
    lnF_b = jnp.stack([pad1(p['lnF_b'], Dp) for p in block_params])[:, None, :]
    w1 = jnp.stack([
        jnp.concatenate([pad2(p['w1'][:, :Hf], Dp, Hfp),      # value half
                         pad2(p['w1'][:, Hf:], Dp, Hfp)],     # gate half
                        axis=1)
        for p in block_params]).astype(bf16)                                   # (L, Dp, 2*Hfp)
    b1 = jnp.stack([
        jnp.concatenate([pad1(p['b1'][:Hf], Hfp), pad1(p['b1'][Hf:], Hfp)])
        for p in block_params])[:, None, :]
    w2 = jnp.stack([pad2(p['w2'], Hfp, Dp) for p in block_params]).astype(bf16)
    b2 = jnp.stack([pad1(p['b2'], Dp) for p in block_params])[:, None, :]

    # Head parameters (kept f32; tiny).
    hln_w = pad1(head_params['ln_w'], Dp).reshape(1, Dp)
    hln_b = pad1(head_params['ln_b'], Dp).reshape(1, Dp)
    hw = pad2(head_params['w'], Dp, d_out_pad)
    hb = pad1(head_params['b'], d_out_pad).reshape(1, d_out_pad)

    # Input activations: lane-padded and DMA'd in bf16 (half the bytes).
    x_flat = jnp.pad(x.reshape(B * S, D), ((0, 0), (0, Dp - D))).astype(bf16)

    est = _estimate_vmem_bytes(batch_tile * S, D, Dp, Hfp, S, n_heads, d_out_pad)
    vmem_limit = int(min(max(32 * 2 ** 20, 2 * est), 48 * 2 ** 20))

    # ------------------------------ BlockSpecs ---------------------------------
    def per_layer(shape_tail):
        nd = len(shape_tail)
        return pl.BlockSpec((1,) + tuple(shape_tail),
                            lambda b, l: (l,) + (0,) * nd)

    def resident(shape):
        zeros = (0,) * len(shape)
        return pl.BlockSpec(tuple(shape), lambda b, l: zeros)

    in_specs = [
        pl.BlockSpec((batch_tile * S, Dp), lambda b, l: (b, 0)),    # x (bf16)
        per_layer((1, Dp)), per_layer((1, Dp)),                      # lnA w/b
        per_layer((Dp, 3 * Dp)), per_layer((1, 3 * Dp)),             # wqkv, bqkv
        per_layer((D, Dp)), per_layer((1, Dp)),                      # wo, bo
        per_layer((1, Dp)), per_layer((1, Dp)),                      # lnF w/b
        per_layer((Dp, 2 * Hfp)), per_layer((1, 2 * Hfp)),           # w1, b1
        per_layer((Hfp, Dp)), per_layer((1, Dp)),                    # w2, b2
        resident((1, Dp)), resident((1, Dp)),                        # head LN w/b
        resident((Dp, d_out_pad)), resident((1, d_out_pad)),         # head w/b
    ]
    out_spec = pl.BlockSpec((batch_tile, d_out_pad), lambda b, l: (b, 0))

    kernel = functools.partial(
        _fused_transformer_kernel, n_heads=n_heads, n_tokens=S,
        batch_tile=batch_tile, d_model=D, scale=1.0 / math.sqrt(dh))

    out = pl.pallas_call(
        kernel,
        out_shape=jax.ShapeDtypeStruct((B, d_out_pad), f32),
        grid=(B // batch_tile, n_blocks),
        in_specs=in_specs,
        out_specs=out_spec,
        scratch_shapes=[pltpu.VMEM((batch_tile * S, Dp), f32)],
        compiler_params=pltpu.CompilerParams(
            dimension_semantics=("parallel", "arbitrary"),
            vmem_limit_bytes=vmem_limit),
    )(x_flat,
      lnA_w, lnA_b, wqkv, bqkv, wo, bo,
      lnF_w, lnF_b, w1, b1, w2, b2,
      hln_w, hln_b, hw, hb)

    return out[:, :d_out]


# ----------------------------- pure-JAX reference ------------------------------
def transformer_reference(x, block_params, head_params, *, n_heads,
                          matmul_dtype=jnp.float32):
    """Module-semantics reference. matmul_dtype=bf16 mimics the kernel's MXU casts."""
    def ln(z, w, b):
        mu = jnp.mean(z, axis=-1, keepdims=True)
        var = jnp.mean((z - mu) ** 2, axis=-1, keepdims=True)
        return (z - mu) / jnp.sqrt(var + LN_EPS) * w + b

    def mm(a, w):
        return jnp.dot(a.astype(matmul_dtype), w.astype(matmul_dtype),
                       preferred_element_type=jnp.float32)

    def bmm(eq, a, b_):
        return jnp.einsum(eq, a.astype(matmul_dtype), b_.astype(matmul_dtype),
                          preferred_element_type=jnp.float32)

    B, S, D = x.shape
    d_head = D // n_heads
    for layer_idx, p in enumerate(block_params):
        x_res = ln(x, p['lnA_w'], p['lnA_b']) if layer_idx > 0 else x
        q = mm(x_res, p['wq']) + p['bq']
        k = mm(x_res, p['wk']) + p['bk']
        v = mm(x_res, p['wv']) + p['bv']

        def split(t):
            return t.reshape(B, S, n_heads, d_head).transpose(0, 2, 1, 3)

        qh, kh, vh = split(q), split(k), split(v)
        logits = bmm('bhqd,bhkd->bhqk', qh, kh) / math.sqrt(d_head)
        probs = jax.nn.softmax(logits, axis=-1)
        o = bmm('bhqk,bhkd->bhqd', probs, vh)
        o = o.transpose(0, 2, 1, 3).reshape(B, S, D)
        x = x + (mm(o, p['wo']) + p['bo'])

        x_res = ln(x, p['lnF_w'], p['lnF_b'])
        h1 = mm(x_res, p['w1']) + p['b1']
        d_hidden = p['w2'].shape[0]
        h_act = h1[..., :d_hidden] * jax.nn.relu(h1[..., d_hidden:])
        x = x + (mm(h_act, p['w2']) + p['b2'])

    z = x[:, -1, :]
    z = ln(z, head_params['ln_w'], head_params['ln_b'])
    z = jax.nn.relu(z)
    return z @ head_params['w'] + head_params['b']    # head linear stays f32 (matches kernel)


# ----------------------------- parameter init ----------------------------------
def init_params(key, *, n_blocks, d_token, ffn_d_hidden, d_out):
    def nxt():
        nonlocal key
        key, sub = jax.random.split(key)
        return sub

    def dense(d_in, d_out_):
        w = jax.random.normal(nxt(), (d_in, d_out_), jnp.float32) * (1.0 / math.sqrt(d_in))
        b = jax.random.normal(nxt(), (d_out_,), jnp.float32) * 0.01
        return w, b

    blocks = []
    for _ in range(n_blocks):
        p = {}
        p['lnA_w'] = jnp.ones((d_token,), jnp.float32)
        p['lnA_b'] = jnp.zeros((d_token,), jnp.float32)
        p['wq'], p['bq'] = dense(d_token, d_token)
        p['wk'], p['bk'] = dense(d_token, d_token)
        p['wv'], p['bv'] = dense(d_token, d_token)
        p['wo'], p['bo'] = dense(d_token, d_token)
        p['lnF_w'] = jnp.ones((d_token,), jnp.float32)
        p['lnF_b'] = jnp.zeros((d_token,), jnp.float32)
        p['w1'], p['b1'] = dense(d_token, 2 * ffn_d_hidden)   # ReGLU doubles the first linear
        p['w2'], p['b2'] = dense(ffn_d_hidden, d_token)
        blocks.append(p)

    head = {}
    head['ln_w'] = jnp.ones((d_token,), jnp.float32)
    head['ln_b'] = jnp.zeros((d_token,), jnp.float32)
    head['w'], head['b'] = dense(d_token, d_out)
    return blocks, head


# ----------------------------- main --------------------------------------------
if __name__ == "__main__":
    # TODO(synk): dropout layers (attention/ffn/residual) are rate-0 / eval-mode no-ops;
    # Linformer kv_compression and last_layer_query_idx are None in this config.
    B, S = 2, 8
    d_token, n_heads = 64, 4
    ffn_d_hidden = 128
    n_blocks = 2
    d_out = 4

    key = jax.random.PRNGKey(0)
    key, xkey = jax.random.split(key)
    x = jax.random.normal(xkey, (B, S, d_token), jnp.float32)

    block_params, head_params = init_params(
        key, n_blocks=n_blocks, d_token=d_token, ffn_d_hidden=ffn_d_hidden, d_out=d_out)

    fwd = jax.jit(lambda x_, bp, hp: transformer_forward(x_, bp, hp, n_heads=n_heads))
    out = jax.block_until_ready(fwd(x, block_params, head_params))

    # The kernel DMAs x in bf16; feed the bf16-matmul reference the same rounding
    # so the tight comparison isolates kernel-vs-reference math.
    x_rounded = x.astype(jnp.bfloat16).astype(jnp.float32)
    ref_bf16 = jax.block_until_ready(
        transformer_reference(x_rounded, block_params, head_params, n_heads=n_heads,
                              matmul_dtype=jnp.bfloat16))
    ref_f32 = jax.block_until_ready(
        transformer_reference(x, block_params, head_params, n_heads=n_heads,
                              matmul_dtype=jnp.float32))

    assert out.shape == (B, d_out), out.shape
    # vs an identically-quantized (bf16-matmul, f32-accumulate) reference: tight.
    np.testing.assert_allclose(np.asarray(out), np.asarray(ref_bf16), rtol=3e-2, atol=3e-2)
    # vs the pure-f32 module semantics: loose, accounting for bf16 MXU inputs + bf16 x.
    np.testing.assert_allclose(np.asarray(out), np.asarray(ref_f32), rtol=1e-1, atol=1e-1)
    print("KERNEL_OK")
</pallas_src>

<mosaic_0001>
module attributes {stable_mosaic.version = 11 : i64} {
  func.func @_fused_transformer_kernel(%arg0: i32, %arg1: i32, %arg2: memref<16x128xbf16, #tpu.memory_space<vmem>>, %arg3: memref<1x1x128xf32, #tpu.memory_space<vmem>>, %arg4: memref<1x1x128xf32, #tpu.memory_space<vmem>>, %arg5: memref<1x128x384xbf16, #tpu.memory_space<vmem>>, %arg6: memref<1x1x384xf32, #tpu.memory_space<vmem>>, %arg7: memref<1x64x128xbf16, #tpu.memory_space<vmem>>, %arg8: memref<1x1x128xf32, #tpu.memory_space<vmem>>, %arg9: memref<1x1x128xf32, #tpu.memory_space<vmem>>, %arg10: memref<1x1x128xf32, #tpu.memory_space<vmem>>, %arg11: memref<1x128x256xbf16, #tpu.memory_space<vmem>>, %arg12: memref<1x1x256xf32, #tpu.memory_space<vmem>>, %arg13: memref<1x128x128xbf16, #tpu.memory_space<vmem>>, %arg14: memref<1x1x128xf32, #tpu.memory_space<vmem>>, %arg15: memref<1x128xf32, #tpu.memory_space<vmem>>, %arg16: memref<1x128xf32, #tpu.memory_space<vmem>>, %arg17: memref<128x128xf32, #tpu.memory_space<vmem>>, %arg18: memref<1x128xf32, #tpu.memory_space<vmem>>, %arg19: memref<2x128xf32, #tpu.memory_space<vmem>>, %arg20: memref<16x128xf32, #tpu.memory_space<vmem>>) attributes {dimension_semantics = [#tpu.dimension_semantics<parallel>, #tpu.dimension_semantics<arbitrary>], iteration_bounds = array<i64: 1, 2>, scalar_prefetch = 0 : i64, scratch_operands = 1 : i64, tpu.core_type = #tpu.core_type<tc>, window_params = [{transform_indices = @transform_0, window_bounds = array<i64: 16, 128>}, {transform_indices = @transform_1, window_bounds = array<i64: 1, 1, 128>}, {transform_indices = @transform_2, window_bounds = array<i64: 1, 1, 128>}, {transform_indices = @transform_3, window_bounds = array<i64: 1, 128, 384>}, {transform_indices = @transform_4, window_bounds = array<i64: 1, 1, 384>}, {transform_indices = @transform_5, window_bounds = array<i64: 1, 64, 128>}, {transform_indices = @transform_6, window_bounds = array<i64: 1, 1, 128>}, {transform_indices = @transform_7, window_bounds = array<i64: 1, 1, 128>}, {transform_indices = @transform_8, window_bounds = array<i64: 1, 1, 128>}, {transform_indices = @transform_9, window_bounds = array<i64: 1, 128, 256>}, {transform_indices = @transform_10, window_bounds = array<i64: 1, 1, 256>}, {transform_indices = @transform_11, window_bounds = array<i64: 1, 128, 128>}, {transform_indices = @transform_12, window_bounds = array<i64: 1, 1, 128>}, {pipeline_mode = #tpu.pipeline_mode<synchronous>, transform_indices = @transform_13, window_bounds = array<i64: 1, 128>}, {pipeline_mode = #tpu.pipeline_mode<synchronous>, transform_indices = @transform_14, window_bounds = array<i64: 1, 128>}, {pipeline_mode = #tpu.pipeline_mode<synchronous>, transform_indices = @transform_15, window_bounds = array<i64: 128, 128>}, {pipeline_mode = #tpu.pipeline_mode<synchronous>, transform_indices = @transform_16, window_bounds = array<i64: 1, 128>}, {transform_indices = @transform_17, window_bounds = array<i64: 2, 128>}]} {
    %c0_i32 = arith.constant 0 : i32
    %0 = arith.cmpi eq, %arg1, %c0_i32 : i32
    %1 = arith.extui %0 : i1 to i32
    %c0_i32_0 = arith.constant 0 : i32
    %2 = arith.cmpi ne, %1, %c0_i32_0 : i32
    scf.if %2 {
      %c0_63 = arith.constant 0 : index
      %c0_64 = arith.constant 0 : index
      %163 = vector.load %arg2[%c0_63, %c0_64] : memref<16x128xbf16, #tpu.memory_space<vmem>>, vector<16x128xbf16>
      %164 = arith.extf %163 : vector<16x128xbf16> to vector<16x128xf32>
      %c0_65 = arith.constant 0 : index
      %c0_66 = arith.constant 0 : index
      %165 = vector.load %arg20[%c0_65, %c0_66] : memref<16x128xf32, #tpu.memory_space<vmem>>, vector<16x128xf32>
      tpu.vector_store %arg20[%c0_65, %c0_66], %164 {strides = array<i32>} : memref<16x128xf32, #tpu.memory_space<vmem>>, vector<16x128xf32>,
    } else {
    }
    %c0 = arith.constant 0 : index
    %c0_1 = arith.constant 0 : index
    %3 = vector.load %arg20[%c0, %c0_1] : memref<16x128xf32, #tpu.memory_space<vmem>>, vector<16x128xf32>
    %c0_2 = arith.constant 0 : index
    %c0_3 = arith.constant 0 : index
    %c0_4 = arith.constant 0 : index
    %4 = vector.load %arg3[%c0_2, %c0_3, %c0_4] : memref<1x1x128xf32, #tpu.memory_space<vmem>>, vector<1x1x128xf32>
    %5 = vector.shape_cast %4 : vector<1x1x128xf32> to vector<1x128xf32>
    %c0_5 = arith.constant 0 : index
    %c0_6 = arith.constant 0 : index
    %c0_7 = arith.constant 0 : index
    %6 = vector.load %arg4[%c0_5, %c0_6, %c0_7] : memref<1x1x128xf32, #tpu.memory_space<vmem>>, vector<1x1x128xf32>
    %7 = vector.shape_cast %6 : vector<1x1x128xf32> to vector<1x128xf32>
    %cst = arith.constant dense<0.000000e+00> : vector<16xf32>
    %8 = vector.multi_reduction <add>, %3, %cst [1] : vector<16x128xf32> to vector<16xf32>
    %9 = vector.shape_cast %8 : vector<16xf32> to vector<16x1xf32>
    %cst_8 = arith.constant 1.562500e-02 : f32
    %10 = vector.broadcast %cst_8 : f32 to vector<16x1xf32>
    %11 = arith.mulf %9, %10 : vector<16x1xf32>
    %12 = arith.mulf %3, %3 : vector<16x128xf32>
    %cst_9 = arith.constant dense<0.000000e+00> : vector<16xf32>
    %13 = vector.multi_reduction <add>, %12, %cst_9 [1] : vector<16x128xf32> to vector<16xf32>
    %14 = vector.shape_cast %13 : vector<16xf32> to vector<16x1xf32>
    %cst_10 = arith.constant 1.562500e-02 : f32
    %15 = vector.broadcast %cst_10 : f32 to vector<16x1xf32>
    %16 = arith.mulf %14, %15 : vector<16x1xf32>
    %17 = arith.mulf %11, %11 : vector<16x1xf32>
    %18 = arith.subf %16, %17 : vector<16x1xf32>
    %cst_11 = arith.constant 0.000000e+00 : f32
    %19 = vector.broadcast %cst_11 : f32 to vector<16x1xf32>
    %20 = arith.maximumf %18, %19 : vector<16x1xf32>
    %21 = vector.broadcast %11 : vector<16x1xf32> to vector<16x128xf32>
    %22 = arith.subf %3, %21 : vector<16x128xf32>
    %cst_12 = arith.constant 9.99999974E-6 : f32
    %23 = vector.broadcast %cst_12 : f32 to vector<16x1xf32>
    %24 = arith.addf %20, %23 : vector<16x1xf32>
    %25 = math.rsqrt %24 : vector<16x1xf32>
    %26 = vector.broadcast %25 : vector<16x1xf32> to vector<16x128xf32>
    %27 = arith.mulf %22, %26 : vector<16x128xf32>
    %28 = vector.broadcast %5 : vector<1x128xf32> to vector<16x128xf32>
    %29 = arith.mulf %27, %28 : vector<16x128xf32>
    %30 = vector.broadcast %7 : vector<1x128xf32> to vector<16x128xf32>
    %31 = arith.addf %29, %30 : vector<16x128xf32>
    %c0_i32_13 = arith.constant 0 : i32
    %32 = arith.cmpi sgt, %arg1, %c0_i32_13 : i32
    %33 = arith.select %32, %31, %3 : vector<16x128xf32>
    %34 = arith.truncf %33 : vector<16x128xf32> to vector<16x128xbf16>
    %c0_14 = arith.constant 0 : index
    %c0_15 = arith.constant 0 : index
    %c0_16 = arith.constant 0 : index
    %35 = vector.load %arg5[%c0_14, %c0_15, %c0_16] : memref<1x128x384xbf16, #tpu.memory_space<vmem>>, vector<1x128x384xbf16>
    %36 = vector.shape_cast %35 : vector<1x128x384xbf16> to vector<128x384xbf16>
    %cst_17 = arith.constant dense<0.000000e+00> : vector<16x384xf32>
    %37 = tpu.matmul %34, %36, %cst_17 {dimension_numbers = #tpu.dot_dimension_numbers<[1], [0], [0], [1], [0, 0, 1, 1], [], []>} : vector<16x128xbf16>, vector<128x384xbf16>, vector<16x384xf32> -> vector<16x384xf32>
    %c0_18 = arith.constant 0 : index
    %c0_19 = arith.constant 0 : index
    %c0_20 = arith.constant 0 : index
    %38 = vector.load %arg6[%c0_18, %c0_19, %c0_20] : memref<1x1x384xf32, #tpu.memory_space<vmem>>, vector<1x1x384xf32>
    %39 = vector.shape_cast %38 : vector<1x1x384xf32> to vector<1x384xf32>
    %40 = vector.broadcast %39 : vector<1x384xf32> to vector<16x384xf32>
    %41 = arith.addf %37, %40 : vector<16x384xf32>
    %42 = vector.extract_strided_slice %41 {offsets = [0, 0], sizes = [16, 128], strides = [1, 1]} : vector<16x384xf32> to vector<16x128xf32>
    %43 = arith.truncf %42 : vector<16x128xf32> to vector<16x128xbf16>
    %44 = vector.extract_strided_slice %41 {offsets = [0, 128], sizes = [16, 128], strides = [1, 1]} : vector<16x384xf32> to vector<16x128xf32>
    %45 = arith.truncf %44 : vector<16x128xf32> to vector<16x128xbf16>
    %46 = vector.extract_strided_slice %41 {offsets = [0, 256], sizes = [16, 128], strides = [1, 1]} : vector<16x384xf32> to vector<16x128xf32>
    %47 = arith.truncf %46 : vector<16x128xf32> to vector<16x128xbf16>
    %48 = vector.extract_strided_slice %43 {offsets = [0, 0], sizes = [16, 16], strides = [1, 1]} : vector<16x128xbf16> to vector<16x16xbf16>
    %49 = vector.shape_cast %48 : vector<16x16xbf16> to vector<2x8x16xbf16>
    %50 = vector.extract_strided_slice %43 {offsets = [0, 16], sizes = [16, 16], strides = [1, 1]} : vector<16x128xbf16> to vector<16x16xbf16>
    %51 = vector.shape_cast %50 : vector<16x16xbf16> to vector<2x8x16xbf16>
    %52 = vector.extract_strided_slice %43 {offsets = [0, 32], sizes = [16, 16], strides = [1, 1]} : vector<16x128xbf16> to vector<16x16xbf16>
    %53 = vector.shape_cast %52 : vector<16x16xbf16> to vector<2x8x16xbf16>
    %54 = vector.extract_strided_slice %43 {offsets = [0, 48], sizes = [16, 16], strides = [1, 1]} : vector<16x128xbf16> to vector<16x16xbf16>
    %55 = vector.shape_cast %54 : vector<16x16xbf16> to vector<2x8x16xbf16>
    %56 = tpu.concatenate %49, %51, %53, %55 in 0 : vector<2x8x16xbf16>, vector<2x8x16xbf16>, vector<2x8x16xbf16>, vector<2x8x16xbf16> -> vector<8x8x16xbf16>
    %57 = vector.extract_strided_slice %45 {offsets = [0, 0], sizes = [16, 16], strides = [1, 1]} : vector<16x128xbf16> to vector<16x16xbf16>
    %58 = vector.shape_cast %57 : vector<16x16xbf16> to vector<2x8x16xbf16>
    %59 = vector.extract_strided_slice %45 {offsets = [0, 16], sizes = [16, 16], strides = [1, 1]} : vector<16x128xbf16> to vector<16x16xbf16>
    %60 = vector.shape_cast %59 : vector<16x16xbf16> to vector<2x8x16xbf16>
    %61 = vector.extract_strided_slice %45 {offsets = [0, 32], sizes = [16, 16], strides = [1, 1]} : vector<16x128xbf16> to vector<16x16xbf16>
    %62 = vector.shape_cast %61 : vector<16x16xbf16> to vector<2x8x16xbf16>
    %63 = vector.extract_strided_slice %45 {offsets = [0, 48], sizes = [16, 16], strides = [1, 1]} : vector<16x128xbf16> to vector<16x16xbf16>
    %64 = vector.shape_cast %63 : vector<16x16xbf16> to vector<2x8x16xbf16>
    %65 = tpu.concatenate %58, %60, %62, %64 in 0 : vector<2x8x16xbf16>, vector<2x8x16xbf16>, vector<2x8x16xbf16>, vector<2x8x16xbf16> -> vector<8x8x16xbf16>
    %66 = vector.extract_strided_slice %47 {offsets = [0, 0], sizes = [16, 16], strides = [1, 1]} : vector<16x128xbf16> to vector<16x16xbf16>
    %67 = vector.shape_cast %66 : vector<16x16xbf16> to vector<2x8x16xbf16>
    %68 = vector.extract_strided_slice %47 {offsets = [0, 16], sizes = [16, 16], strides = [1, 1]} : vector<16x128xbf16> to vector<16x16xbf16>
    %69 = vector.shape_cast %68 : vector<16x16xbf16> to vector<2x8x16xbf16>
    %70 = vector.extract_strided_slice %47 {offsets = [0, 32], sizes = [16, 16], strides = [1, 1]} : vector<16x128xbf16> to vector<16x16xbf16>
    %71 = vector.shape_cast %70 : vector<16x16xbf16> to vector<2x8x16xbf16>
    %72 = vector.extract_strided_slice %47 {offsets = [0, 48], sizes = [16, 16], strides = [1, 1]} : vector<16x128xbf16> to vector<16x16xbf16>
    %73 = vector.shape_cast %72 : vector<16x16xbf16> to vector<2x8x16xbf16>
    %74 = tpu.concatenate %67, %69, %71, %73 in 0 : vector<2x8x16xbf16>, vector<2x8x16xbf16>, vector<2x8x16xbf16>, vector<2x8x16xbf16> -> vector<8x8x16xbf16>
    "tpu.trace_start"() <{level = 10 : i32, message = "bqd,bkd->bqk"}> : () -> ()
    %cst_21 = arith.constant dense<0.000000e+00> : vector<8x8x8xf32>
    %75 = tpu.matmul %56, %65, %cst_21 {dimension_numbers = #tpu.dot_dimension_numbers<[2], [2], [1], [1], [0, 0, 0, 1, 1, 1], [0], [0]>} : vector<8x8x16xbf16>, vector<8x8x16xbf16>, vector<8x8x8xf32> -> vector<8x8x8xf32>
    "tpu.trace_stop"() : () -> ()
    %cst_22 = arith.constant 2.500000e-01 : f32
    %76 = vector.broadcast %cst_22 : f32 to vector<8x8x8xf32>
    %77 = arith.mulf %75, %76 : vector<8x8x8xf32>
    %cst_23 = arith.constant dense<0xFF800000> : vector<8x8xf32>
    %78 = vector.multi_reduction <maximumf>, %77, %cst_23 [2] : vector<8x8x8xf32> to vector<8x8xf32>
    %79 = vector.shape_cast %78 : vector<8x8xf32> to vector<8x8x1xf32>
    %80 = vector.broadcast %79 : vector<8x8x1xf32> to vector<8x8x8xf32>
    %81 = arith.subf %77, %80 : vector<8x8x8xf32>
    %82 = math.exp %81 : vector<8x8x8xf32>
    %cst_24 = arith.constant dense<0.000000e+00> : vector<8x8xf32>
    %83 = vector.multi_reduction <add>, %82, %cst_24 [2] : vector<8x8x8xf32> to vector<8x8xf32>
    %84 = vector.shape_cast %83 : vector<8x8xf32> to vector<8x8x1xf32>
    %85 = tpu.reciprocal %84 {approx = true} : vector<8x8x1xf32> -> vector<8x8x1xf32>
    %86 = vector.broadcast %85 : vector<8x8x1xf32> to vector<8x8x8xf32>
    %87 = arith.mulf %82, %86 : vector<8x8x8xf32>
    %88 = arith.truncf %87 : vector<8x8x8xf32> to vector<8x8x8xbf16>
    "tpu.trace_start"() <{level = 10 : i32, message = "bqk,bkd->bqd"}> : () -> ()
    %cst_25 = arith.constant dense<0.000000e+00> : vector<8x8x16xf32>
    %89 = tpu.matmul %88, %74, %cst_25 {dimension_numbers = #tpu.dot_dimension_numbers<[2], [1], [1], [2], [0, 0, 0, 1, 1, 2], [0], [0]>} : vector<8x8x8xbf16>, vector<8x8x16xbf16>, vector<8x8x16xf32> -> vector<8x8x16xf32>
    "tpu.trace_stop"() : () -> ()
    %90 = arith.truncf %89 : vector<8x8x16xf32> to vector<8x8x16xbf16>
    %91 = vector.shape_cast %90 : vector<8x8x16xbf16> to vector<4x16x16xbf16>
    %92 = vector.extract_strided_slice %91 {offsets = [0, 0, 0], sizes = [1, 16, 16], strides = [1, 1, 1]} : vector<4x16x16xbf16> to vector<1x16x16xbf16>
    %93 = vector.shape_cast %92 : vector<1x16x16xbf16> to vector<16x16xbf16>
    %94 = vector.extract_strided_slice %91 {offsets = [1, 0, 0], sizes = [1, 16, 16], strides = [1, 1, 1]} : vector<4x16x16xbf16> to vector<1x16x16xbf16>
    %95 = vector.shape_cast %94 : vector<1x16x16xbf16> to vector<16x16xbf16>
    %96 = vector.extract_strided_slice %91 {offsets = [2, 0, 0], sizes = [1, 16, 16], strides = [1, 1, 1]} : vector<4x16x16xbf16> to vector<1x16x16xbf16>
    %97 = vector.shape_cast %96 : vector<1x16x16xbf16> to vector<16x16xbf16>
    %98 = vector.extract_strided_slice %91 {offsets = [3, 0, 0], sizes = [1, 16, 16], strides = [1, 1, 1]} : vector<4x16x16xbf16> to vector<1x16x16xbf16>
    %99 = vector.shape_cast %98 : vector<1x16x16xbf16> to vector<16x16xbf16>
    %100 = tpu.concatenate %93, %95, %97, %99 in 1 : vector<16x16xbf16>, vector<16x16xbf16>, vector<16x16xbf16>, vector<16x16xbf16> -> vector<16x64xbf16>
    %c0_26 = arith.constant 0 : index
    %c0_27 = arith.constant 0 : index
    %c0_28 = arith.constant 0 : index
    %101 = vector.load %arg7[%c0_26, %c0_27, %c0_28] : memref<1x64x128xbf16, #tpu.memory_space<vmem>>, vector<1x64x128xbf16>
    %102 = vector.shape_cast %101 : vector<1x64x128xbf16> to vector<64x128xbf16>
    %cst_29 = arith.constant dense<0.000000e+00> : vector<16x128xf32>
    %103 = tpu.matmul %100, %102, %cst_29 {dimension_numbers = #tpu.dot_dimension_numbers<[1], [0], [0], [1], [0, 0, 1, 1], [], []>} : vector<16x64xbf16>, vector<64x128xbf16>, vector<16x128xf32> -> vector<16x128xf32>
    %c0_30 = arith.constant 0 : index
    %c0_31 = arith.constant 0 : index
    %c0_32 = arith.constant 0 : index
    %104 = vector.load %arg8[%c0_30, %c0_31, %c0_32] : memref<1x1x128xf32, #tpu.memory_space<vmem>>, vector<1x1x128xf32>
    %105 = vector.shape_cast %104 : vector<1x1x128xf32> to vector<1x128xf32>
    %106 = vector.broadcast %105 : vector<1x128xf32> to vector<16x128xf32>
    %107 = arith.addf %103, %106 : vector<16x128xf32>
    %108 = arith.addf %3, %107 : vector<16x128xf32>
    %c0_33 = arith.constant 0 : index
    %c0_34 = arith.constant 0 : index
    %c0_35 = arith.constant 0 : index
    %109 = vector.load %arg9[%c0_33, %c0_34, %c0_35] : memref<1x1x128xf32, #tpu.memory_space<vmem>>, vector<1x1x128xf32>
    %110 = vector.shape_cast %109 : vector<1x1x128xf32> to vector<1x128xf32>
    %c0_36 = arith.constant 0 : index
    %c0_37 = arith.constant 0 : index
    %c0_38 = arith.constant 0 : index
    %111 = vector.load %arg10[%c0_36, %c0_37, %c0_38] : memref<1x1x128xf32, #tpu.memory_space<vmem>>, vector<1x1x128xf32>
    %112 = vector.shape_cast %111 : vector<1x1x128xf32> to vector<1x128xf32>
    %cst_39 = arith.constant dense<0.000000e+00> : vector<16xf32>
    %113 = vector.multi_reduction <add>, %108, %cst_39 [1] : vector<16x128xf32> to vector<16xf32>
    %114 = vector.shape_cast %113 : vector<16xf32> to vector<16x1xf32>
    %cst_40 = arith.constant 1.562500e-02 : f32
    %115 = vector.broadcast %cst_40 : f32 to vector<16x1xf32>
    %116 = arith.mulf %114, %115 : vector<16x1xf32>
    %117 = arith.mulf %108, %108 : vector<16x128xf32>
    %cst_41 = arith.constant dense<0.000000e+00> : vector<16xf32>
    %118 = vector.multi_reduction <add>, %117, %cst_41 [1] : vector<16x128xf32> to vector<16xf32>
    %119 = vector.shape_cast %118 : vector<16xf32> to vector<16x1xf32>
    %cst_42 = arith.constant 1.562500e-02 : f32
    %120 = vector.broadcast %cst_42 : f32 to vector<16x1xf32>
    %121 = arith.mulf %119, %120 : vector<16x1xf32>
    %122 = arith.mulf %116, %116 : vector<16x1xf32>
    %123 = arith.subf %121, %122 : vector<16x1xf32>
    %cst_43 = arith.constant 0.000000e+00 : f32
    %124 = vector.broadcast %cst_43 : f32 to vector<16x1xf32>
    %125 = arith.maximumf %123, %124 : vector<16x1xf32>
    %126 = vector.broadcast %116 : vector<16x1xf32> to vector<16x128xf32>
    %127 = arith.subf %108, %126 : vector<16x128xf32>
    %cst_44 = arith.constant 9.99999974E-6 : f32
    %128 = vector.broadcast %cst_44 : f32 to vector<16x1xf32>
    %129 = arith.addf %125, %128 : vector<16x1xf32>
    %130 = math.rsqrt %129 : vector<16x1xf32>
    %131 = vector.broadcast %130 : vector<16x1xf32> to vector<16x128xf32>
    %132 = arith.mulf %127, %131 : vector<16x128xf32>
    %133 = vector.broadcast %110 : vector<1x128xf32> to vector<16x128xf32>
    %134 = arith.mulf %132, %133 : vector<16x128xf32>
    %135 = vector.broadcast %112 : vector<1x128xf32> to vector<16x128xf32>
    %136 = arith.addf %134, %135 : vector<16x128xf32>
    %137 = arith.truncf %136 : vector<16x128xf32> to vector<16x128xbf16>
    %c0_45 = arith.constant 0 : index
    %c0_46 = arith.constant 0 : index
    %c0_47 = arith.constant 0 : index
    %138 = vector.load %arg11[%c0_45, %c0_46, %c0_47] : memref<1x128x256xbf16, #tpu.memory_space<vmem>>, vector<1x128x256xbf16>
    %139 = vector.shape_cast %138 : vector<1x128x256xbf16> to vector<128x256xbf16>
    %cst_48 = arith.constant dense<0.000000e+00> : vector<16x256xf32>
    %140 = tpu.matmul %137, %139, %cst_48 {dimension_numbers = #tpu.dot_dimension_numbers<[1], [0], [0], [1], [0, 0, 1, 1], [], []>} : vector<16x128xbf16>, vector<128x256xbf16>, vector<16x256xf32> -> vector<16x256xf32>
    %c0_49 = arith.constant 0 : index
    %c0_50 = arith.constant 0 : index
    %c0_51 = arith.constant 0 : index
    %141 = vector.load %arg12[%c0_49, %c0_50, %c0_51] : memref<1x1x256xf32, #tpu.memory_space<vmem>>, vector<1x1x256xf32>
    %142 = vector.shape_cast %141 : vector<1x1x256xf32> to vector<1x256xf32>
    %143 = vector.broadcast %142 : vector<1x256xf32> to vector<16x256xf32>
    %144 = arith.addf %140, %143 : vector<16x256xf32>
    %145 = vector.extract_strided_slice %144 {offsets = [0, 0], sizes = [16, 128], strides = [1, 1]} : vector<16x256xf32> to vector<16x128xf32>
    %146 = vector.extract_strided_slice %144 {offsets = [0, 128], sizes = [16, 128], strides = [1, 1]} : vector<16x256xf32> to vector<16x128xf32>
    %cst_52 = arith.constant 0.000000e+00 : f32
    %147 = vector.broadcast %cst_52 : f32 to vector<16x128xf32>
    %148 = arith.maximumf %146, %147 : vector<16x128xf32>
    %149 = arith.mulf %145, %148 : vector<16x128xf32>
    %150 = arith.truncf %149 : vector<16x128xf32> to vector<16x128xbf16>
    %c0_53 = arith.constant 0 : index
    %c0_54 = arith.constant 0 : index
    %c0_55 = arith.constant 0 : index
    %151 = vector.load %arg13[%c0_53, %c0_54, %c0_55] : memref<1x128x128xbf16, #tpu.memory_space<vmem>>, vector<1x128x128xbf16>
    %152 = vector.shape_cast %151 : vector<1x128x128xbf16> to vector<128x128xbf16>
    %cst_56 = arith.constant dense<0.000000e+00> : vector<16x128xf32>
    %153 = tpu.matmul %150, %152, %cst_56 {dimension_numbers = #tpu.dot_dimension_numbers<[1], [0], [0], [1], [0, 0, 1, 1], [], []>} : vector<16x128xbf16>, vector<128x128xbf16>, vector<16x128xf32> -> vector<16x128xf32>
    %c0_57 = arith.constant 0 : index
    %c0_58 = arith.constant 0 : index
    %c0_59 = arith.constant 0 : index
    %154 = vector.load %arg14[%c0_57, %c0_58, %c0_59] : memref<1x1x128xf32, #tpu.memory_space<vmem>>, vector<1x1x128xf32>
    %155 = vector.shape_cast %154 : vector<1x1x128xf32> to vector<1x128xf32>
    %156 = vector.broadcast %155 : vector<1x128xf32> to vector<16x128xf32>
    %157 = arith.addf %153, %156 : vector<16x128xf32>
    %158 = arith.addf %108, %157 : vector<16x128xf32>
    %c0_60 = arith.constant 0 : index
    %c0_61 = arith.constant 0 : index
    %159 = vector.load %arg20[%c0_60, %c0_61] : memref<16x128xf32, #tpu.memory_space<vmem>>, vector<16x128xf32>
    tpu.vector_store %arg20[%c0_60, %c0_61], %158 {strides = array<i32>} : memref<16x128xf32, #tpu.memory_space<vmem>>, vector<16x128xf32>,
    %c1_i32 = arith.constant 1 : i32
    %160 = arith.cmpi eq, %arg1, %c1_i32 : i32
    %161 = arith.extui %160 : i1 to i32
    %c0_i32_62 = arith.constant 0 : i32
    %162 = arith.cmpi ne, %161, %c0_i32_62 : i32
    scf.if %162 {
      %163 = vector.shape_cast %158 : vector<16x128xf32> to vector<2x8x128xf32>
      %164 = vector.extract_strided_slice %163 {offsets = [0, 7, 0], sizes = [2, 1, 128], strides = [1, 1, 1]} : vector<2x8x128xf32> to vector<2x1x128xf32>
      %165 = vector.shape_cast %164 : vector<2x1x128xf32> to vector<2x128xf32>
      %c0_63 = arith.constant 0 : index
      %c0_64 = arith.constant 0 : index
      %166 = vector.load %arg15[%c0_63, %c0_64] : memref<1x128xf32, #tpu.memory_space<vmem>>, vector<1x128xf32>
      %c0_65 = arith.constant 0 : index
      %c0_66 = arith.constant 0 : index
      %167 = vector.load %arg16[%c0_65, %c0_66] : memref<1x128xf32, #tpu.memory_space<vmem>>, vector<1x128xf32>
      %cst_67 = arith.constant dense<0.000000e+00> : vector<2xf32>
      %168 = vector.multi_reduction <add>, %165, %cst_67 [1] : vector<2x128xf32> to vector<2xf32>
      %169 = vector.shape_cast %168 : vector<2xf32> to vector<2x1xf32>
      %cst_68 = arith.constant 1.562500e-02 : f32
      %170 = vector.broadcast %cst_68 : f32 to vector<2x1xf32>
      %171 = arith.mulf %169, %170 : vector<2x1xf32>
      %172 = arith.mulf %165, %165 : vector<2x128xf32>
      %cst_69 = arith.constant dense<0.000000e+00> : vector<2xf32>
      %173 = vector.multi_reduction <add>, %172, %cst_69 [1] : vector<2x128xf32> to vector<2xf32>
      %174 = vector.shape_cast %173 : vector<2xf32> to vector<2x1xf32>
      %cst_70 = arith.constant 1.562500e-02 : f32
      %175 = vector.broadcast %cst_70 : f32 to vector<2x1xf32>
      %176 = arith.mulf %174, %175 : vector<2x1xf32>
      %177 = arith.mulf %171, %171 : vector<2x1xf32>
      %178 = arith.subf %176, %177 : vector<2x1xf32>
      %cst_71 = arith.constant 0.000000e+00 : f32
      %179 = vector.broadcast %cst_71 : f32 to vector<2x1xf32>
      %180 = arith.maximumf %178, %179 : vector<2x1xf32>
      %181 = vector.broadcast %171 : vector<2x1xf32> to vector<2x128xf32>
      %182 = arith.subf %165, %181 : vector<2x128xf32>
      %cst_72 = arith.constant 9.99999974E-6 : f32
      %183 = vector.broadcast %cst_72 : f32 to vector<2x1xf32>
      %184 = arith.addf %180, %183 : vector<2x1xf32>
      %185 = math.rsqrt %184 : vector<2x1xf32>
      %186 = vector.broadcast %185 : vector<2x1xf32> to vector<2x128xf32>
      %187 = arith.mulf %182, %186 : vector<2x128xf32>
      %188 = vector.broadcast %166 : vector<1x128xf32> to vector<2x128xf32>
      %189 = arith.mulf %187, %188 : vector<2x128xf32>
      %190 = vector.broadcast %167 : vector<1x128xf32> to vector<2x128xf32>
      %191 = arith.addf %189, %190 : vector<2x128xf32>
      %cst_73 = arith.constant 0.000000e+00 : f32
      %192 = vector.broadcast %cst_73 : f32 to vector<2x128xf32>
      %193 = arith.maximumf %191, %192 : vector<2x128xf32>
      %c0_74 = arith.constant 0 : index
      %c0_75 = arith.constant 0 : index
      %194 = vector.load %arg17[%c0_74, %c0_75] : memref<128x128xf32, #tpu.memory_space<vmem>>, vector<128x128xf32>
      %cst_76 = arith.constant dense<0.000000e+00> : vector<2x128xf32>
      %195 = tpu.matmul %193, %194, %cst_76 {dimension_numbers = #tpu.dot_dimension_numbers<[1], [0], [0], [1], [0, 0, 1, 1], [], []>} : vector<2x128xf32>, vector<128x128xf32>, vector<2x128xf32> -> vector<2x128xf32>
      %c0_77 = arith.constant 0 : index
      %c0_78 = arith.constant 0 : index
      %196 = vector.load %arg18[%c0_77, %c0_78] : memref<1x128xf32, #tpu.memory_space<vmem>>, vector<1x128xf32>
      %197 = vector.broadcast %196 : vector<1x128xf32> to vector<2x128xf32>
      %198 = arith.addf %195, %197 : vector<2x128xf32>
      %c0_79 = arith.constant 0 : index
      %c0_80 = arith.constant 0 : index
      %199 = vector.load %arg19[%c0_79, %c0_80] : memref<2x128xf32, #tpu.memory_space<vmem>>, vector<2x128xf32>
      tpu.vector_store %arg19[%c0_79, %c0_80], %198 {strides = array<i32>} : memref<2x128xf32, #tpu.memory_space<vmem>>, vector<2x128xf32>,
    } else {
    }
    return
  }
  func.func @transform_0(%arg0: i32, %arg1: i32) -> (i32, i32) {
    %c0_i32 = arith.constant 0 : i32
    %c0_i32_0 = arith.constant 0 : i32
    return %arg0, %c0_i32 : i32, i32
  }
  func.func @transform_1(%arg0: i32, %arg1: i32) -> (i32, i32, i32) {
    %c0_i32 = arith.constant 0 : i32
    %c0_i32_0 = arith.constant 0 : i32
    %c0_i32_1 = arith.constant 0 : i32
    return %arg1, %c0_i32, %c0_i32_0 : i32, i32, i32
  }
  func.func @transform_2(%arg0: i32, %arg1: i32) -> (i32, i32, i32) {
    %c0_i32 = arith.constant 0 : i32
    %c0_i32_0 = arith.constant 0 : i32
    %c0_i32_1 = arith.constant 0 : i32
    return %arg1, %c0_i32, %c0_i32_0 : i32, i32, i32
  }
  func.func @transform_3(%arg0: i32, %arg1: i32) -> (i32, i32, i32) {
    %c0_i32 = arith.constant 0 : i32
    %c0_i32_0 = arith.constant 0 : i32
    %c0_i32_1 = arith.constant 0 : i32
    return %arg1, %c0_i32, %c0_i32_0 : i32, i32, i32
  }
  func.func @transform_4(%arg0: i32, %arg1: i32) -> (i32, i32, i32) {
    %c0_i32 = arith.constant 0 : i32
    %c0_i32_0 = arith.constant 0 : i32
    %c0_i32_1 = arith.constant 0 : i32
    return %arg1, %c0_i32, %c0_i32_0 : i32, i32, i32
  }
  func.func @transform_5(%arg0: i32, %arg1: i32) -> (i32, i32, i32) {
    %c0_i32 = arith.constant 0 : i32
    %c0_i32_0 = arith.constant 0 : i32
    %c0_i32_1 = arith.constant 0 : i32
    return %arg1, %c0_i32, %c0_i32_0 : i32, i32, i32
  }
  func.func @transform_6(%arg0: i32, %arg1: i32) -> (i32, i32, i32) {
    %c0_i32 = arith.constant 0 : i32
    %c0_i32_0 = arith.constant 0 : i32
    %c0_i32_1 = arith.constant 0 : i32
    return %arg1, %c0_i32, %c0_i32_0 : i32, i32, i32
  }
  func.func @transform_7(%arg0: i32, %arg1: i32) -> (i32, i32, i32) {
    %c0_i32 = arith.constant 0 : i32
    %c0_i32_0 = arith.constant 0 : i32
    %c0_i32_1 = arith.constant 0 : i32
    return %arg1, %c0_i32, %c0_i32_0 : i32, i32, i32
  }
  func.func @transform_8(%arg0: i32, %arg1: i32) -> (i32, i32, i32) {
    %c0_i32 = arith.constant 0 : i32
    %c0_i32_0 = arith.constant 0 : i32
    %c0_i32_1 = arith.constant 0 : i32
    return %arg1, %c0_i32, %c0_i32_0 : i32, i32, i32
  }
  func.func @transform_9(%arg0: i32, %arg1: i32) -> (i32, i32, i32) {
    %c0_i32 = arith.constant 0 : i32
    %c0_i32_0 = arith.constant 0 : i32
    %c0_i32_1 = arith.constant 0 : i32
    return %arg1, %c0_i32, %c0_i32_0 : i32, i32, i32
  }
  func.func @transform_10(%arg0: i32, %arg1: i32) -> (i32, i32, i32) {
    %c0_i32 = arith.constant 0 : i32
    %c0_i32_0 = arith.constant 0 : i32
    %c0_i32_1 = arith.constant 0 : i32
    return %arg1, %c0_i32, %c0_i32_0 : i32, i32, i32
  }
  func.func @transform_11(%arg0: i32, %arg1: i32) -> (i32, i32, i32) {
    %c0_i32 = arith.constant 0 : i32
    %c0_i32_0 = arith.constant 0 : i32
    %c0_i32_1 = arith.constant 0 : i32
    return %arg1, %c0_i32, %c0_i32_0 : i32, i32, i32
  }
  func.func @transform_12(%arg0: i32, %arg1: i32) -> (i32, i32, i32) {
    %c0_i32 = arith.constant 0 : i32
    %c0_i32_0 = arith.constant 0 : i32
    %c0_i32_1 = arith.constant 0 : i32
    return %arg1, %c0_i32, %c0_i32_0 : i32, i32, i32
  }
  func.func @transform_13(%arg0: i32, %arg1: i32) -> (i32, i32) {
    %c0_i32 = arith.constant 0 : i32
    %c0_i32_0 = arith.constant 0 : i32
    %c0_i32_1 = arith.constant 0 : i32
    return %c0_i32, %c0_i32_0 : i32, i32
  }
  func.func @transform_14(%arg0: i32, %arg1: i32) -> (i32, i32) {
    %c0_i32 = arith.constant 0 : i32
    %c0_i32_0 = arith.constant 0 : i32
    %c0_i32_1 = arith.constant 0 : i32
    return %c0_i32, %c0_i32_0 : i32, i32
  }
  func.func @transform_15(%arg0: i32, %arg1: i32) -> (i32, i32) {
    %c0_i32 = arith.constant 0 : i32
    %c0_i32_0 = arith.constant 0 : i32
    %c0_i32_1 = arith.constant 0 : i32
    return %c0_i32, %c0_i32_0 : i32, i32
  }
  func.func @transform_16(%arg0: i32, %arg1: i32) -> (i32, i32) {
    %c0_i32 = arith.constant 0 : i32
    %c0_i32_0 = arith.constant 0 : i32
    %c0_i32_1 = arith.constant 0 : i32
    return %c0_i32, %c0_i32_0 : i32, i32
  }
  func.func @transform_17(%arg0: i32, %arg1: i32) -> (i32, i32) {
    %c0_i32 = arith.constant 0 : i32
    %c0_i32_0 = arith.constant 0 : i32
    return %arg0, %c0_i32 : i32, i32
  }
}

</mosaic_0001>

<bundles_post_ra>
// kernel: _lambda_.1
= control target key start
LH: loop header
LB: loop body
LE: loop exit
PB: predicated region body
PF: predicated region fallthrough
CT: control target
= control target key end

     0   :  { %s3201_s0 = inlined_call_operand.vmem [shape: bf16[16,128], index: 0, kind: input, shape index: {}]   ;;  %s3202_s1 = inlined_call_operand.vmem [shape: f32[2,1,128], index: 1, kind: input, shape index: {}]   ;;  %s3203_s2 = inlined_call_operand.vmem [shape: f32[2,1,128], index: 2, kind: input, shape index: {}]   ;;  %s3204_s3 = inlined_call_operand.vmem [shape: bf16[2,128,384], index: 3, kind: input, shape index: {}]   ;;  %s3205_s4 = inlined_call_operand.vmem [shape: f32[2,1,384], index: 4, kind: input, shape index: {}]   ;;  %s3206_s5 = inlined_call_operand.vmem [shape: bf16[2,64,128], index: 5, kind: input, shape index: {}]   ;;  %s3207_s6 = inlined_call_operand.vmem [shape: f32[2,1,128], index: 6, kind: input, shape index: {}]   ;;  %s3208_s7 = inlined_call_operand.vmem [shape: f32[2,1,128], index: 7, kind: input, shape index: {}]   ;;  %s3209_s8 = inlined_call_operand.vmem [shape: f32[2,1,128], index: 8, kind: input, shape index: {}]   ;;  %s3210_s9 = inlined_call_operand.vmem [shape: bf16[2,128,256], index: 9, kind: input, shape index: {}]   ;;  %s3211_s10 = inlined_call_operand.vmem [shape: f32[2,1,256], index: 10, kind: input, shape index: {}]   ;;  %s3212_s11 = inlined_call_operand.vmem [shape: bf16[2,128,128], index: 11, kind: input, shape index: {}]   ;;  %s3213_s12 = inlined_call_operand.vmem [shape: f32[2,1,128], index: 12, kind: input, shape index: {}]   ;;  %s3214_s13 = inlined_call_operand.vmem [shape: f32[1,128], index: 13, kind: input, shape index: {}]   ;;  %s3215_s14 = inlined_call_operand.vmem [shape: f32[1,128], index: 14, kind: input, shape index: {}]   ;;  %s3216_s15 = inlined_call_operand.vmem [shape: f32[128,128], index: 15, kind: input, shape index: {}]   ;;  %s3217_s16 = inlined_call_operand.vmem [shape: f32[1,128], index: 16, kind: input, shape index: {}]   ;;  %s3218_s17 = inlined_call_operand.hbm [shape: f32[2,128], index: 17, kind: output, shape index: {}]  }
   0x1   :  { %3221 = sst [smem:[#allocation9_spill]] %s3201_s0 }
   0x2   :  { %3222 = sst [smem:[#allocation10_spill]] %s3202_s1 }
   0x3   :  { %3223 = sst [smem:[#allocation11_spill]] %s3204_s3 }
   0x4   :  { %3224 = sst [smem:[#allocation12_spill]] %s3206_s5 }
   0x5   :  { %3225 = sst [smem:[#allocation13_spill]] %s3214_s13 }
   0x6   :  { %3226 = sst [smem:[#allocation14_spill]] %s3215_s14 }
   0x7   :  { %3227 = sst [smem:[#allocation15_spill]] %s3217_s16 }
   0x8   :  { %3228 = sst [smem:[#allocation16_spill]] %s3218_s17 }
   0x9   :  { %22 = vsyncpa [#allocation4], 0  ;;  %s2753_s24 = smov 0   ;;  %s2755_s25 = smov 0  }
   0xa   :  { %s2757_s26 = smov 0  }
   0xb LB: > { %3229 = sst [smem:[#allocation6_spill]] %s2650_s25  ;;  %s37_s28 = sadd.s32 1, %s2650_s25  ;;  %s2654_s26 = sphi %s2757_s26, %s28_s26   ;;  %s2650_s25 = sphi %s2755_s25, %s3249_s25   ;;  %s2646_s24 = sphi %s2753_s24, %s3248_s24  }
   0xc   : > { %3230 = sst [smem:[#allocation7_spill]] %s2654_s26  ;;  %p38_p0 = scmp.ge.s32.totalorder %s37_s28, 2 }
   0xd   : > { %p2209_p1 = scmp.ge.s32.totalorder %s2654_s26, 1  ;;  %p607_p2 = scmp.lt.s32.totalorder %s2654_s26, 3 }
   0xe   : > { %s3251_s28 = smov (%p38_p0, %s37_s28), 0 }
   0xf   : > { %3231 = sst [smem:[#allocation8_spill]] %s3251_s28  ;;  %p608_p3 = pnand %p2209_p1, %p607_p2 }
  0x10   : > { %p706_p4 = scmp.lt.s32.totalorder (!%p608_p3), %s2646_s24, 1  ;;  %s3233_s5 = sld [smem:[#allocation12_spill]] (!%p608_p3) }
  0x11   : > { %611 = sbr.rel (%p608_p3) target bundleno = 2066 (0x812), region = 88  ;;  %s3234_s3 = sld [smem:[#allocation11_spill]] (!%p608_p3) }
  0x12   : > { %p2218_p5 = scmp.ne.s32.totalorder (!%p608_p3), %s2646_s24, 0 }
  0x16   : > { %s2776_s29 = scalar_select %p706_p4, %s2646_s24, 1 }
  0x18   : > { %s2508_s22 = smul.u32 192, %s2776_s29  ;;  %s2449_s23 = sshll.u32 %s2776_s29, 5 }
  0x19   : > { %s2509_s27 = smul.u32 3, %s2776_s29  ;;  %s2792_s28 = scalar_lea.vmem %s3233_s5, %s2449_s23 }
  0x1a   : > { %s2797_s26 = scalar_lea.vmem %s3234_s3, %s2508_s22  ;;  %s731_s0 = scalar_lea.vmem %s3208_s7, %s2776_s29 }
  0x1b   : > { %s2806_s21 = scalar_lea.vmem %s3205_s4, %s2509_s27  ;;  %s2450_s17 = sshll.u32 %s2776_s29, 7 }
  0x1c   : > { %s2820_s3 = scalar_lea.vmem %s3210_s9, %s2450_s17  ;;  %s2215_s16 = sshll.u32 %s2776_s29, 1 }
  0x1d   : > { %s2826_s27 = scalar_lea.vmem %s3211_s10, %s2215_s16  ;;  %s2451_s1 = sshll.u32 %s2776_s29, 6 }
  0x1e   : > { %s2832_s14 = scalar_lea.vmem %s3212_s11, %s2451_s1  ;;  %s751_s5 = scalar_lea.vmem %s3213_s12, %s2776_s29 }
  0x1f   : > { %756 = sbr.rel (%p2218_p5) target bundleno = 42 (0x2a), region = 92  ;;  %s3235_s22 = sld [smem:[#allocation9_spill]] (!%p2218_p5) }
  0x25   : > { %v2505_v0 = vld [vmem:[%s3235_s22] sm:$0xff]  }
  0x26   : > { %v2506_v1 = vunpack.c.l.bf16 %v2505_v0  ;;  %v2507_v2 = vunpack.c.h.bf16 %v2505_v0 }
  0x28   : > { %761 = vst [vmem:[#allocation2] sm:$0xff] %v2506_v1 }
  0x29   : > { %762 = vst [vmem:[#allocation2 + $0x8] sm:$0xff] %v2507_v2 }
  0x2a PF: > { %v2305_v7 = vld [vmem:[%s2797_s26 + $0xa8] sm:$0xf]  ;;  %v2474_v8 = vld [vmem:[%s2797_s26 + $0xb0] sm:$0xf0]  ;;  %v2473_v9 = vld [vmem:[%s2797_s26 + $0xac] sm:$0xf]  ;;  %s3238_s23 = scalar_lea.vmem %s3203_s2, %s2776_s29  ;;  %s3240_s13 = scalar_lea.vmem %s3209_s8, %s2776_s29 }
  0x2b   : > { %v2306_v10 = vor.u32 %v2474_v8, %v2305_v7  ;;  %v2307_v11 = vld [vmem:[%s2797_s26 + $0xb4] sm:$0xf0]  ;;  %v2313_v12 = vld [vmem:[%s2797_s26 + $0xb0] sm:$0xf]  ;;  %v2475_v13 = vld [vmem:[%s2797_s26 + $0xb8] sm:$0xf0] }
  0x2c   : > { %v2310_v14 = vor.u32 %v2473_v9, %v2307_v11  ;;  %v2314_v15 = vor.u32 %v2475_v13, %v2313_v12  ;;  %v2293_v16 = vld [vmem:[%s2797_s26 + $0x90] sm:$0xf]  ;;  %v2471_v17 = vld [vmem:[%s2797_s26 + $0x98] sm:$0xf0]  ;;  %v2470_v18 = vld [vmem:[%s2797_s26 + $0x94] sm:$0xf] }
  0x2d   : > { %998 = vmatpush.bf16.msra.mxu0 %v2306_v10  ;;  %v2294_v19 = vor.u32 %v2471_v17, %v2293_v16  ;;  %v2295_v20 = vld [vmem:[%s2797_s26 + $0x9c] sm:$0xf0]  ;;  %v2301_v21 = vld [vmem:[%s2797_s26 + $0x98] sm:$0xf]  ;;  %v2472_v22 = vld [vmem:[%s2797_s26 + $0xa0] sm:$0xf0] }
  0x2e   : > { %1012 = vmatpush.bf16.msra.mxu1 %v2310_v14  ;;  %1026 = vmatpush.bf16.msra.mxu2 %v2314_v15  ;;  %v2298_v23 = vor.u32 %v2470_v18, %v2295_v20  ;;  %v2302_v24 = vor.u32 %v2472_v22, %v2301_v21  ;;  %v2281_v25 = vld [vmem:[%s2797_s26 + $0x78] sm:$0xf]  ;;  %v2468_v26 = vld [vmem:[%s2797_s26 + $0x80] sm:$0xf0]  ;;  %v2467_v27 = vld [vmem:[%s2797_s26 + $0x7c] sm:$0xf] }
  0x2f   : > { %v2842_v3 = vld [vmem:[#allocation2] sm:$0xff]  ;;  %v2282_v28 = vor.u32 %v2468_v26, %v2281_v25  ;;  %v2283_v29 = vld [vmem:[%s2797_s26 + $0x84] sm:$0xf0]  ;;  %v2469_v31 = vld [vmem:[%s2797_s26 + $0x88] sm:$0xf0]  ;;  %p823_p6 = scmp.gt.s32.totalorder %s2646_s24, 0 }
  0x30   : > { %767 = vadd.xlane.f32.xlu0 %v2842_v3  ;;  %v773_v4 = vmul.f32 %v2842_v3, %v2842_v3  ;;  %v2847_v5 = vld [vmem:[#allocation2 + $0x8] sm:$0xff]  ;;  %v2289_v30 = vld [vmem:[%s2797_s26 + $0x80] sm:$0xf]  ;;  %v2286_v32 = vor.u32 %v2467_v27, %v2283_v29  ;;  %v2464_v36 = vld [vmem:[%s2797_s26 + $0x64] sm:$0xf]  ;;  %s3236_s16 = sld [smem:[#allocation10_spill]] }
  0x31   : > { %v774_v6 = vmul.f32 %v2847_v5, %v2847_v5  ;;  %999 = vmatpush.bf16.msra.mxu0 %v2294_v19  ;;  %v2290_v33 = vor.u32 %v2469_v31, %v2289_v30  ;;  %v2269_v34 = vld [vmem:[%s2797_s26 + $0x60] sm:$0xf]  ;;  %v2465_v35 = vld [vmem:[%s2797_s26 + $0x68] sm:$0xf0]  ;;  %v2271_v38 = vld [vmem:[%s2797_s26 + $0x6c] sm:$0xf0] }
  0x32   : > { %775 = vadd.xlane.f32.xlu1 %v773_v4  ;;  %1013 = vmatpush.bf16.msra.mxu1 %v2298_v23  ;;  %v2270_v37 = vor.u32 %v2465_v35, %v2269_v34  ;;  %v2277_v39 = vld [vmem:[%s2797_s26 + $0x68] sm:$0xf]  ;;  %v2466_v40 = vld [vmem:[%s2797_s26 + $0x70] sm:$0xf0]  ;;  %v2274_v41 = vor.u32 %v2464_v36, %v2271_v38  ;;  %v2461_v45 = vld [vmem:[%s2797_s26 + $0x4c] sm:$0xf] }
  0x33   : > { %1027 = vmatpush.bf16.msra.mxu2 %v2302_v24  ;;  %v2278_v42 = vor.u32 %v2466_v40, %v2277_v39  ;;  %v2257_v43 = vld [vmem:[%s2797_s26 + $0x48] sm:$0xf]  ;;  %v2462_v44 = vld [vmem:[%s2797_s26 + $0x50] sm:$0xf0]  ;;  %v2259_v47 = vld [vmem:[%s2797_s26 + $0x54] sm:$0xf0] }
  0x34   : > { %v2258_v46 = vor.u32 %v2462_v44, %v2257_v43  ;;  %v2265_v48 = vld [vmem:[%s2797_s26 + $0x50] sm:$0xf]  ;;  %v2463_v49 = vld [vmem:[%s2797_s26 + $0x58] sm:$0xf0]  ;;  %v2262_v50 = vor.u32 %v2461_v45, %v2259_v47  ;;  %v2458_v58 = vld [vmem:[%s2797_s26 + $0x34] sm:$0xf] }
  0x35   : > { %1000 = vmatpush.bf16.msra.mxu0 %v2282_v28  ;;  %v2266_v51 = vor.u32 %v2463_v49, %v2265_v48  ;;  %v2245_v54 = vld [vmem:[%s2797_s26 + $0x30] sm:$0xf]  ;;  %v2459_v55 = vld [vmem:[%s2797_s26 + $0x38] sm:$0xf0]  ;;  %v2247_v59 = vld [vmem:[%s2797_s26 + $0x3c] sm:$0xf0] }
  0x36   : > { %1014 = vmatpush.bf16.msra.mxu1 %v2286_v32  ;;  %v2246_v57 = vor.u32 %v2459_v55, %v2245_v54  ;;  %v2253_v60 = vld [vmem:[%s2797_s26 + $0x38] sm:$0xf]  ;;  %v2250_v63 = vor.u32 %v2458_v58, %v2247_v59  ;;  %v2460_v0 = vld [vmem:[%s2797_s26 + $0x40] sm:$0xf0]  ;;  %v2455_v7 = vld [vmem:[%s2797_s26 + $0x1c] sm:$0xf]  ;;  %s3237_s18 = scalar_lea.vmem %s3236_s16, %s2776_s29 }
  0x37   : > { %1028 = vmatpush.bf16.msra.mxu2 %v2290_v33  ;;  %v2254_v1 = vor.u32 %v2460_v0, %v2253_v60  ;;  %v2233_v4 = vld [vmem:[%s2797_s26 + $0x18] sm:$0xf]  ;;  %v2235_v9 = vld [vmem:[%s2797_s26 + $0x24] sm:$0xf0]  ;;  %v2241_v10 = vld [vmem:[%s2797_s26 + $0x20] sm:$0xf] }
  0x38   : > { %769 = vadd.xlane.f32.xlu0 %v2847_v5  ;;  %v2457_v11 = vld [vmem:[%s2797_s26 + $0x28] sm:$0xf0]  ;;  %v2238_v13 = vor.u32 %v2455_v7, %v2235_v9  ;;  %v2221_v15 = vld [vmem:[%s2797_s26] sm:$0xf]  ;;  %v2452_v19 = vld [vmem:[%s2797_s26 + $0x4] sm:$0xf] }
  0x39   : > { %1001 = vmatpush.bf16.msra.mxu0 %v2270_v37  ;;  %v2242_v14 = vor.u32 %v2457_v11, %v2241_v10  ;;  %v2453_v16 = vld [vmem:[%s2797_s26 + $0x8] sm:$0xf0]  ;;  %v2223_v20 = vld [vmem:[%s2797_s26 + $0xc] sm:$0xf0]  ;;  %v2229_v21 = vld [vmem:[%s2797_s26 + $0x8] sm:$0xf] }
  0x3a   : > { %777 = vadd.xlane.f32.xlu1 %v774_v6  ;;  %1015 = vmatpush.bf16.msra.mxu1 %v2274_v41  ;;  %v2456_v6 = vld [vmem:[%s2797_s26 + $0x20] sm:$0xf0]  ;;  %v2222_v18 = vor.u32 %v2453_v16, %v2221_v15  ;;  %v2226_v24 = vor.u32 %v2452_v19, %v2223_v20  ;;  %v2454_v25 = vld [vmem:[%s2797_s26 + $0x10] sm:$0xf0]  ;;  %s824_s1 = scalar_select %p823_p6, 1, 0 }
  0x3b   : > { %1029 = vmatpush.bf16.msra.mxu2 %v2278_v42  ;;  %v2234_v8 = vor.u32 %v2456_v6, %v2233_v4  ;;  %v2230_v27 = vor.u32 %v2454_v25, %v2229_v21  ;;  %vm1088_vm7 = vcmask 130048   ;;  %s2656_s30 = smov 112   ;;  %s2657_s17 = smov 96   ;;  %vm1349_vm8 = vcmask 1043456  }
  0x3c   : > { %v825_v54 = vstv %s824_s1  ;;  %vm1249_vm9 = vcmask 64512   ;;  %s2659_s25 = smov 16   ;;  %s2660_s22 = smov 32   ;;  %vm1536_vm10 = vcmask 261120   ;;  %vm1539_vm11 = vcmask 392192  }
  0x3d   : > { %1002 = vmatpush.bf16.msra.mxu0 %v2258_v46  ;;  %v2547_v46 = vld [vmem:[%s3237_s18] ss:$0 sm:$0xff]  ;;  %vm826_vm6 = vcmp.eq.s32.totalorder %v825_v54, 1  ;;  %s2661_s26 = smov 48   ;;  %vm1578_vm12 = vcmask 523264   ;;  %p2444_p7 = scmp.ne.s32.totalorder %s2646_s24, 1 }
  0x3e   : > { %1016 = vmatpush.bf16.msra.mxu1 %v2262_v50  ;;  %s3242_s1 = sld [smem:[#allocation14_spill]] (!%p2444_p7) }
  0x3f   : > { %1030 = vmatpush.bf16.msra.mxu2 %v2266_v51  ;;  %v2548_v51 = vld [vmem:[%s3238_s23] ss:$0 sm:$0xff] }
  0x41   : > { %1003 = vmatpush.bf16.msra.mxu0 %v2246_v57 }
  0x42   : > { %1017 = vmatpush.bf16.msra.mxu1 %v2250_v63 }
  0x43   : > { %1031 = vmatpush.bf16.msra.mxu2 %v2254_v1 }
  0x45   : > { %1004 = vmatpush.bf16.msra.mxu0 %v2234_v8 }
  0x46   : > { %1018 = vmatpush.bf16.msra.mxu1 %v2238_v13 }
  0x47   : > { %1032 = vmatpush.bf16.msra.mxu2 %v2242_v14 }
  0x49   : > { %1005 = vmatpush.bf16.msra.mxu0 %v2222_v18 }
  0x4a   : > { %1019 = vmatpush.bf16.msra.mxu1 %v2226_v24 }
  0x4b   : > { %1033 = vmatpush.bf16.msra.mxu2 %v2230_v27 }
  0xa3   : > { %v768_v52 = vpop.xlane.xlu0 %767 }
  0xa4   : > { %v2882_v53 = vmul.f32 0.015625, %v768_v52 }
  0xa5   : > { %v776_v56 = vpop.xlane.xlu1 %775 }
  0xa6   : > { %v781_v61 = vmul.f32 %v2882_v53, %v2882_v53  ;;  %v779_v62 = vmul.f32 0.015625, %v776_v56  ;;  %v787_v43 = vsub.f32 %v2842_v3, %v2882_v53 }
  0xa8   : > { %v783_v2 = vsub.f32 %v779_v62, %v781_v61  ;;  %v862_v61 = vld [vmem:[%s2806_s21] sm:$0x7]  ;;  %s2658_s21 = smov 80  }
  0xa9   : > { %v865_v62 = vperm.slane %v862_v61, 1 }
  0xaa   : > { %v785_v12 = vmax.f32 %v783_v2, 0.0  ;;  %v864_v2 = vperm.slane %v862_v61, 0 }
  0xab   : > { %v770_v17 = vpop.xlane.xlu0 %769 }
  0xac   : > { %v789_v22 = vadd.f32 1e-05, %v785_v12  ;;  %v772_v23 = vmul.f32 0.015625, %v770_v17 }
  0xad   : > { %v778_v26 = vpop.xlane.xlu1 %777 }
  0xae   : > { %2553 = vrsqrt.f32 %v789_v22  ;;  %v782_v28 = vmul.f32 %v772_v23, %v772_v23  ;;  %v780_v29 = vmul.f32 0.015625, %v778_v26  ;;  %vm797_vm1 = vweird.f32 %v789_v22 }
  0xaf   : > { %v788_v49 = vsub.f32 %v2847_v5, %v772_v23  ;;  %v866_v23 = vperm.slane %v862_v61, 2 }
  0xb0   : > { %v784_v30 = vsub.f32 %v780_v29, %v782_v28 }
  0xb2   : > { %v786_v31 = vmax.f32 %v784_v30, 0.0 }
  0xb4   : > { %v2554_v32 = vpop.eup %2553  ;;  %v790_v34 = vadd.f32 1e-05, %v786_v31 }
  0xb5   : > { %v792_v33 = vmul.f32 %v2554_v32, %v789_v22  ;;  %vm798_vm0 = vweird.f32 %v2554_v32 }
  0xb6   : > { %2555 = vrsqrt.f32 %v790_v34  ;;  %vm799_vm2 = vmor %vm797_vm1, %vm798_vm0  ;;  %vm807_vm4 = vweird.f32 %v790_v34 }
  0xb7   : > { %v793_v35 = vmul.f32 %v2554_v32, %v792_v33 }
  0xb9   : > { %v794_v36 = vmul.f32 0.5, %v793_v35 }
  0xbb   : > { %v795_v37 = vsub.f32 1.5, %v794_v36 }
  0xbc   : > { %v2556_v38 = vpop.eup %2555 }
  0xbd   : > { %v796_v39 = vmul.f32 %v2554_v32, %v795_v37  ;;  %v802_v40 = vmul.f32 %v2556_v38, %v790_v34  ;;  %vm808_vm3 = vweird.f32 %v2556_v38 }
  0xbe   : > { %vm809_vm5 = vmor %vm807_vm4, %vm808_vm3 }
  0xbf   : > { %v800_v41 = vsel %vm799_vm2, %v2554_v32, %v796_v39  ;;  %v803_v42 = vmul.f32 %v2556_v38, %v802_v40 }
  0xc0   : > { %v811_v45 = vmul.f32 %v800_v41, %v787_v43 }
  0xc1   : > { %v804_v44 = vmul.f32 0.5, %v803_v42 }
  0xc2   : > { %v816_v50 = vmul.f32 %v2547_v46, %v811_v45 }
  0xc3   : > { %v805_v47 = vsub.f32 1.5, %v804_v44 }
  0xc4   : > { %v821_v56 = vadd.f32 %v2548_v51, %v816_v50 }
  0xc5   : > { %v806_v48 = vmul.f32 %v2556_v38, %v805_v47 }
  0xc6   : > { %v827_v58 = vsel %vm826_vm6, %v821_v56, %v2842_v3 }
  0xc7   : > { %v810_v52 = vsel %vm809_vm5, %v2556_v38, %v806_v48 }
  0xc8   : > { %v812_v53 = vmul.f32 %v810_v52, %v788_v49 }
  0xca   : > { %v817_v55 = vmul.f32 %v2547_v46, %v812_v53 }
  0xcc   : > { %v822_v57 = vadd.f32 %v2548_v51, %v817_v55 }
  0xce   : > { %v828_v59 = vsel %vm826_vm6, %v822_v57, %v2847_v5 }
  0xcf   : > { %v829_v60 = vpack.c.bf16 %v828_v59, %v827_v58 }
  0xd1   : > { %1006 = vmatmul.bf16.vlgmr.msra.gmra.mxu0 %v829_v60  ;;  %1020 = vmatmul.bf16.vlgmr.msra.gmra.mxu1 %v829_v60 }
  0xd2   : > { %1034 = vmatmul.bf16.vlgmr.msra.gmra.mxu2 %v829_v60 }
 0x14e   : > { %v1021_v63 = vpop.f32.mrf.mxu1  ;;  %v1007_v4 = vpop.f32.mrf.mxu0 }
 0x14f   : > { %v1022_v0 = vadd.f32 %v1021_v63, %v865_v62  ;;  %v1008_v7 = vadd.f32 %v1007_v4, %v864_v2 }
 0x151   : > { %v1042_v1 = vpack.c.bf16 %v1022_v0, %v1022_v0  ;;  %v1040_v11 = vpack.c.bf16 %v1008_v7, %v1008_v7 }
 0x153   : > { %1062 = vrot.lane.b32.xlu2 %v1042_v1, %s2656_s30  ;;  %v1093_v6 = vsel %vm1088_vm7, %v1042_v1, 0 }
 0x154   : > { %1102 = vmatpush.bf16.xpose.msra.mxu3 %v1093_v6 }
 0x155   : > { %v1035_v19 = vpop.f32.mrf.mxu2 }
 0x156   : > { %v1023_v8 = vpop.f32.mrf.mxu1  ;;  %v1009_v13 = vpop.f32.mrf.mxu0  ;;  %v1036_v33 = vadd.f32 %v1035_v19, %v866_v23 }
 0x157   : > { %v1024_v9 = vadd.f32 %v1023_v8, %v865_v62  ;;  %v1010_v14 = vadd.f32 %v1009_v13, %v864_v2 }
 0x158   : > { %v2946_v34 = vpack.c.bf16 %v1036_v33, %v1036_v33 }
 0x159   : > { %v1043_v10 = vpack.c.bf16 %v1024_v9, %v1024_v9  ;;  %v1041_v15 = vpack.c.bf16 %v1010_v14, %v1010_v14 }
 0x15a   : > { %v1351_v40 = vsel %vm1349_vm8, %v2946_v34, 0 }
 0x15b   : > { %1068 = vrot.lane.b32.xlu1 %v1043_v10, %s2657_s17  ;;  %1064 = vrot.lane.b32.xlu0 %v1043_v10, %s2656_s30  ;;  %v1112_v12 = vsel %vm1088_vm7, %v1043_v10, 0 }
 0x15c   : > { %1048 = vrot.lane.b32.xlu2 %v1040_v11, %s2656_s30  ;;  %2315 = vmatmul.msk.bf16.vlgmr.msra.gmra.mxu3 %vm1088_vm7, %v1040_v11 }
 0x15d   : > { %1121 = vmatpush.bf16.xpose.msrb.mxu3 %v1112_v12  ;;  %v1037_v22 = vpop.f32.mrf.mxu2 }
 0x15e   : > { %v1038_v25 = vadd.f32 %v1037_v22, %v866_v23 }
 0x160   : > { %v2940_v26 = vpack.c.bf16 %v1038_v25, %v1038_v25 }
 0x162   : > { %v1370_v32 = vsel %vm1349_vm8, %v2940_v26, 0 }
 0x163   : > { %1072 = vrot.lane.b32.xlu1 %v1043_v10, %s2658_s21  ;;  %1056 = vrot.lane.b32.xlu0 %v1040_v11, %s2658_s21 }
 0x164   : > { %1070 = vrot.lane.b32.xlu2 %v1042_v1, %s2658_s21 }
 0x16b   : > { %1052 = vrot.lane.b32.xlu0 %v1040_v11, %s2657_s17 }
 0x16c   : > { %1050 = vrot.lane.b32.xlu2 %v1041_v15, %s2656_s30  ;;  %2316 = vmatmul.msk.bf16.vlgmr.msrb.gmra.mxu3 %vm1088_vm7, %v1041_v15 }
 0x174   : > { %1054 = vrot.lane.b32.xlu2 %v1041_v15, %s2657_s17 }
 0x17c   : > { %1066 = vrot.lane.b32.xlu2 %v1042_v1, %s2657_s17 }
 0x184   : > { %1058 = vrot.lane.b32.xlu2 %v1041_v15, %s2658_s21 }
 0x1ad   : > { %v1063_v16 = vpop.permute.xlu2 %1062 }
 0x1ae   : > { %v1131_v17 = vsel %vm1088_vm7, %v1063_v16, 0 }
 0x1af   : > { %1140 = vmatpush.bf16.xpose.msra.mxu3 %v1131_v17 }
 0x1b6   : > { %v1049_v18 = vpop.permute.xlu2 %1048 }
 0x1b7   : > { %2317 = vmatmul.msk.bf16.vlgmr.msra.gmra.mxu3 %vm1088_vm7, %v1049_v18 }
 0x1be   : > { %v1071_v20 = vpop.permute.xlu2 %1070 }
 0x1bf   : > { %v1207_v21 = vsel %vm1088_vm7, %v1071_v20, 0 }
 0x1c0   : > { %1216 = vmatpush.bf16.xpose.msrb.mxu3 %v1207_v21 }
 0x1c6   : > { %v1051_v24 = vpop.permute.xlu2 %1050 }
 0x1cd   : > { %v1069_v27 = vpop.permute.xlu1 %1068  ;;  %v1065_v28 = vpop.permute.xlu0 %1064 }
 0x1ce   : > { %v1055_v29 = vpop.permute.xlu2 %1054  ;;  %v1150_v30 = vsel %vm1088_vm7, %v1065_v28, 0  ;;  %v1188_v31 = vsel %vm1088_vm7, %v1069_v27, 0 }
 0x1cf   : > { %1159 = vmatpush.bf16.xpose.msrb.mxu1 %v1150_v30  ;;  %1197 = vmatpush.bf16.xpose.msrb.mxu2 %v1188_v31 }
 0x1d5   : > { %v1073_v35 = vpop.permute.xlu1 %1072  ;;  %v1057_v36 = vpop.permute.xlu0 %1056 }
 0x1d6   : > { %v1067_v37 = vpop.permute.xlu2 %1066  ;;  %2318 = vmatmul.msk.bf16.vlgmr.msrb.gmra.mxu1 %vm1088_vm7, %v1051_v24  ;;  %2320 = vmatmul.msk.bf16.vlgmr.msrb.gmra.mxu2 %vm1088_vm7, %v1055_v29  ;;  %v1226_v38 = vsel %vm1088_vm7, %v1073_v35, 0 }
 0x1d7   : > { %1379 = vmatpush.bf16.msra.mxu2 %v1370_v32  ;;  %v1169_v39 = vsel %vm1088_vm7, %v1067_v37, 0  ;;  %2321 = vmatmul.msk.bf16.vlgmr.msrb.gmra.mxu3 %vm1088_vm7, %v1057_v36 }
 0x1d8   : > { %1235 = vmatpush.bf16.xpose.msrb.mxu0 %v1226_v38  ;;  %1178 = vmatpush.bf16.xpose.msra.mxu1 %v1169_v39 }
 0x1dd   : > { %v1053_v45 = vpop.permute.xlu0 %1052 }
 0x1de   : > { %v1059_v41 = vpop.permute.xlu2 %1058 }
 0x1df   : > { %v1104_v42 = vpop.f32.mrf.mxu3  ;;  %2322 = vmatmul.msk.bf16.vlgmr.msrb.gmra.mxu0 %vm1088_vm7, %v1059_v41 }
 0x1e0   : > { %1360 = vmatpush.bf16.msrb.mxu1 %v1351_v40  ;;  %v1241_v43 = vmul.f32 0.25, %v1104_v42 }
 0x1e2   : > { %v1250_v44 = vsel %vm1249_vm9, %v1241_v43, -inf }
 0x1e3   : > { %1251 = vmax.xlane.f32.xlu2 %v1250_v44 }
 0x1e6   : > { %2319 = vmatmul.msk.bf16.vlgmr.msra.gmra.mxu1 %vm1088_vm7, %v1053_v45 }
 0x1e7   : > { %v1106_v46 = vpop.f32.mrf.mxu3 }
 0x1ef   : > { %v1123_v47 = vpop.f32.mrf.mxu3 }
 0x1f0   : > { %v1242_v48 = vmul.f32 0.25, %v1123_v47 }
 0x1f2   : > { %v1253_v49 = vsel %vm1249_vm9, %v1242_v48, -inf }
 0x1f3   : > { %1254 = vmax.xlane.f32.xlu1 %v1253_v49 }
 0x1f7   : > { %v1125_v50 = vpop.f32.mrf.mxu3 }
 0x23a   : > { %v1142_v51 = vpop.f32.mrf.mxu3 }
 0x23b   : > { %v1243_v52 = vmul.f32 0.25, %v1142_v51 }
 0x23d   : > { %v1256_v53 = vsel %vm1249_vm9, %v1243_v52, -inf }
 0x23e   : > { %1257 = vmax.xlane.f32.xlu0 %v1256_v53 }
 0x242   : > { %v1144_v54 = vpop.f32.mrf.mxu3 }
 0x253   : > { %v1161_v55 = vpop.f32.mrf.mxu1 }
 0x254   : > { %v1244_v56 = vmul.f32 0.25, %v1161_v55 }
 0x256   : > { %v1259_v57 = vsel %vm1249_vm9, %v1244_v56, -inf  ;;  %v1252_v60 = vpop.xlane.xlu2 %1251 }
 0x257   : > { %1260 = vmax.xlane.f32.xlu1 %v1259_v57  ;;  %v1274_v2 = vsub.f32 %v1241_v43, %v1252_v60 }
 0x259   : > { %v1199_v58 = vpop.f32.mrf.mxu2  ;;  %v1282_v7 = vmul.f32 1.442695, %v1274_v2 }
 0x25a   : > { %v1218_v59 = vpop.f32.mrf.mxu3  ;;  %v1246_v9 = vmul.f32 0.25, %v1199_v58 }
 0x25b   : > { %v2961_v61 = vmul.f32 0.25, %v1218_v59  ;;  %v1163_v62 = vpop.f32.mrf.mxu1  ;;  %2557 = vpow2.f32 %v1282_v7 }
 0x25c   : > { %v1237_v63 = vpop.f32.mrf.mxu0  ;;  %v1265_v14 = vsel %vm1249_vm9, %v1246_v9, -inf }
 0x25d   : > { %v1248_v0 = vmul.f32 0.25, %v1237_v63  ;;  %v1268_v1 = vsel %vm1249_vm9, %v2961_v61, -inf }
 0x25e   : > { %1269 = vmax.xlane.f32.xlu2 %v1268_v1 }
 0x25f   : > { %v1271_v4 = vsel %vm1249_vm9, %v1248_v0, -inf }
 0x260   : > { %1272 = vmax.xlane.f32.xlu0 %v1271_v4 }
 0x261   : > { %v1201_v6 = vpop.f32.mrf.mxu2  ;;  %v2558_v17 = vpop.eup %2557 }
 0x262   : > { %v1220_v8 = vpop.f32.mrf.mxu3  ;;  %v1298_v18 = vsel %vm1249_vm9, %v2558_v17, 0.0 }
 0x263   : > { %v1180_v10 = vpop.f32.mrf.mxu1 }
 0x264   : > { %v1239_v11 = vpop.f32.mrf.mxu0  ;;  %v1245_v21 = vmul.f32 0.25, %v1180_v10 }
 0x266   : > { %v1255_v12 = vpop.xlane.xlu1 %1254  ;;  %v1262_v22 = vsel %vm1249_vm9, %v1245_v21, -inf }
 0x267   : > { %v1275_v13 = vsub.f32 %v1242_v48, %v1255_v12 }
 0x268   : > { %1266 = vmax.xlane.f32.xlu0 %v1265_v14 }
 0x269   : > { %v1284_v15 = vmul.f32 1.442695, %v1275_v13 }
 0x26b   : > { %2559 = vpow2.f32 %v1284_v15  ;;  %v1182_v16 = vpop.f32.mrf.mxu1 }
 0x270   : > { %1299 = vadd.xlane.f32.xlu0 %v1298_v18  ;;  %1076 = vrot.lane.b32.xlu1 %v2946_v34, %s2656_s30 }
 0x271   : > { %v2560_v19 = vpop.eup %2559 }
 0x272   : > { %v1301_v20 = vsel %vm1249_vm9, %v2560_v19, 0.0 }
 0x273   : > { %1302 = vadd.xlane.f32.xlu2 %v1301_v20 }
 0x284   : > { %1078 = vrot.lane.b32.xlu0 %v2940_v26, %s2656_s30 }
 0x29a   : > { %1263 = vmax.xlane.f32.xlu1 %v1262_v22 }
 0x2b1   : > { %v1258_v23 = vpop.xlane.xlu0 %1257 }
 0x2b2   : > { %v1276_v24 = vsub.f32 %v1243_v52, %v1258_v23 }
 0x2b4   : > { %v1286_v25 = vmul.f32 1.442695, %v1276_v24 }
 0x2b6   : > { %2561 = vpow2.f32 %v1286_v25 }
 0x2bc   : > { %v2974_v27 = vpop.eup %2561 }
 0x2bd   : > { %v1304_v28 = vsel %vm1249_vm9, %v2974_v27, 0.0 }
 0x2be   : > { %1305 = vadd.xlane.f32.xlu1 %v1304_v28 }
 0x2ca   : > { %v1261_v29 = vpop.xlane.xlu1 %1260 }
 0x2cb   : > { %v1277_v30 = vsub.f32 %v1244_v56, %v1261_v29 }
 0x2cd   : > { %v1288_v31 = vmul.f32 1.442695, %v1277_v30 }
 0x2cf   : > { %2563 = vpow2.f32 %v1288_v31 }
 0x2d1   : > { %v1270_v38 = vpop.xlane.xlu2 %1269 }
 0x2d2   : > { %v1280_v42 = vsub.f32 %v2961_v61, %v1270_v38 }
 0x2d3   : > { %v1273_v32 = vpop.xlane.xlu0 %1272 }
 0x2d4   : > { %v1281_v33 = vsub.f32 %v1248_v0, %v1273_v32  ;;  %v1294_v45 = vmul.f32 1.442695, %v1280_v42 }
 0x2d5   : > { %v2978_v35 = vpop.eup %2563 }
 0x2d6   : > { %v1296_v36 = vmul.f32 1.442695, %v1281_v33  ;;  %v1307_v37 = vsel %vm1249_vm9, %v2978_v35, 0.0 }
 0x2d7   : > { %1082 = vrot.lane.b32.xlu1 %v2940_v26, %s2657_s17  ;;  %1308 = vadd.xlane.f32.xlu2 %v1307_v37 }
 0x2d8   : > { %2565 = vpow2.f32 %v1296_v36 }
 0x2db   : > { %v1267_v39 = vpop.xlane.xlu0 %1266 }
 0x2dc   : > { %v1279_v40 = vsub.f32 %v1246_v9, %v1267_v39 }
 0x2de   : > { %v2984_v41 = vpop.eup %2565  ;;  %v1292_v43 = vmul.f32 1.442695, %v1279_v40 }
 0x2df   : > { %1080 = vrot.lane.b32.xlu1 %v2946_v34, %s2657_s17  ;;  %v1319_v44 = vsel %vm1249_vm9, %v2984_v41, 0.0 }
 0x2e0   : > { %2567 = vpow2.f32 %v1292_v43  ;;  %1320 = vadd.xlane.f32.xlu0 %v1319_v44 }
 0x2e2   : > { %v1077_v46 = vpop.permute.xlu1 %1076 }
 0x2e3   : > { %v1389_v47 = vsel %vm1349_vm8, %v1077_v46, 0  ;;  %v1300_v48 = vpop.xlane.xlu0 %1299 }
 0x2e4   : > { %2569 = vrcp.f32 %v1300_v48  ;;  %1398 = vmatpush.bf16.msra.mxu3 %v1389_v47 }
 0x2e5   : > { %2571 = vpow2.f32 %v1294_v45 }
 0x2e6   : > { %v2568_v49 = vpop.eup %2567  ;;  %v1303_v50 = vpop.xlane.xlu2 %1302 }
 0x2e7   : > { %2573 = vrcp.f32 %v1303_v50  ;;  %1086 = vrot.lane.b32.xlu1 %v2940_v26, %s2658_s21  ;;  %v1313_v51 = vsel %vm1249_vm9, %v2568_v49, 0.0 }
 0x2e8   : > { %1314 = vadd.xlane.f32.xlu2 %v1313_v51 }
 0x2ea   : > { %v2570_v52 = vpop.eup %2569 }
 0x2eb   : > { %v1330_v53 = vmul.f32 %v2570_v52, %v2558_v17  ;;  %v2995_v54 = vpop.eup %2571 }
 0x2ec   : > { %v1316_v58 = vsel %vm1249_vm9, %v2995_v54, 0.0 }
 0x2ed   : > { %v2574_v55 = vpop.eup %2573  ;;  %v1338_v56 = vpack.c.bf16 %v1330_v53, %v1330_v53 }
 0x2ee   : > { %v1331_v57 = vmul.f32 %v2574_v55, %v2560_v19 }
 0x2ef   : > { %2323 = vmatmul.msk.bf16.vlgmr.msrb.gmra.mxu1 %vm1249_vm9, %v1338_v56 }
 0x2f0   : > { %v1339_v59 = vpack.c.bf16 %v1331_v57, %v1331_v57  ;;  %1317 = vadd.xlane.f32.xlu2 %v1316_v58 }
 0x2f2   : > { %2324 = vmatmul.msk.bf16.vlgmr.msra.gmra.mxu2 %vm1249_vm9, %v1339_v59 }
 0x2f6   : > { %v1079_v26 = vpop.permute.xlu0 %1078 }
 0x2f7   : > { %v1408_v60 = vsel %vm1349_vm8, %v1079_v26, 0 }
 0x2f8   : > { %1417 = vmatpush.bf16.msra.mxu0 %v1408_v60 }
 0x30d   : > { %v1264_v61 = vpop.xlane.xlu1 %1263 }
 0x30e   : > { %v1278_v62 = vsub.f32 %v1245_v21, %v1264_v61 }
 0x310   : > { %v1290_v63 = vmul.f32 1.442695, %v1278_v62 }
 0x312   : > { %2575 = vpow2.f32 %v1290_v63 }
 0x318   : > { %v2576_v0 = vpop.eup %2575 }
 0x319   : > { %v1310_v1 = vsel %vm1249_vm9, %v2576_v0, 0.0 }
 0x31a   : > { %1311 = vadd.xlane.f32.xlu2 %v1310_v1 }
 0x331   : > { %v1306_v2 = vpop.xlane.xlu1 %1305 }
 0x332   : > { %2577 = vrcp.f32 %v1306_v2  ;;  %1084 = vrot.lane.b32.xlu2 %v2946_v34, %s2658_s21 }
 0x338   : > { %v2578_v4 = vpop.eup %2577 }
 0x339   : > { %v1332_v6 = vmul.f32 %v2578_v4, %v2974_v27 }
 0x33b   : > { %v1340_v7 = vpack.c.bf16 %v1332_v6, %v1332_v6 }
 0x33d   : > { %2325 = vmatmul.msk.bf16.vlgmr.msra.gmra.mxu3 %vm1249_vm9, %v1340_v7 }
 0x349   : > { %v1083_v8 = vpop.permute.xlu1 %1082 }
 0x34a   : > { %v1446_v9 = vsel %vm1349_vm8, %v1083_v8, 0  ;;  %v1309_v10 = vpop.xlane.xlu2 %1308 }
 0x34b   : > { %1455 = vmatpush.bf16.msrb.mxu2 %v1446_v9  ;;  %2579 = vrcp.f32 %v1309_v10  ;;  %v2479_v10 = vld [vmem:[%s2792_s28 + $0x18] sm:$0xff] }
 0x351   : > { %v2580_v11 = vpop.eup %2579  ;;  %v1081_v12 = vpop.permute.xlu1 %1080 }
 0x352   : > { %v1333_v13 = vmul.f32 %v2580_v11, %v2978_v35  ;;  %v1427_v14 = vsel %vm1349_vm8, %v1081_v12, 0  ;;  %v2478_v11 = vld [vmem:[%s2792_s28 + $0x10] sm:$0xff]  ;;  %v2477_v12 = vld [vmem:[%s2792_s28 + $0x8] sm:$0xff] }
 0x353   : > { %1436 = vmatpush.bf16.msra.mxu1 %v1427_v14  ;;  %v1321_v15 = vpop.xlane.xlu0 %1320 }
 0x354   : > { %v1341_v34 = vpack.c.bf16 %v1333_v13, %v1333_v13  ;;  %2581 = vrcp.f32 %v1321_v15  ;;  %v2476_v13 = vld [vmem:[%s2792_s28] sm:$0xff]  ;;  %s3239_s28 = scalar_lea.vmem %s3207_s6, %s2776_s29 }
 0x356   : > { %2326 = vmatmul.msk.bf16.vlgmr.msra.gmra.mxu0 %vm1249_vm9, %v1341_v34 }
 0x357   : > { %1585 = vmatpush.bf16.msrb.mxu1 %v2479_v10  ;;  %v2358_v10 = vld [vmem:[%s2820_s3 + $0x10] sm:$0xf] }
 0x359   : > { %v1087_v16 = vpop.permute.xlu1 %1086 }
 0x35a   : > { %v1484_v17 = vsel %vm1349_vm8, %v1087_v16, 0  ;;  %v2582_v19 = vpop.eup %2581 }
 0x35b   : > { %1493 = vmatpush.bf16.msrb.mxu0 %v1484_v17  ;;  %v1315_v18 = vpop.xlane.xlu2 %1314  ;;  %v1337_v20 = vmul.f32 %v2582_v19, %v2984_v41  ;;  %1586 = vmatpush.bf16.msrb.mxu1 %v2478_v11  ;;  %v2549_v19 = vld [vmem:[%s3239_s28] ss:$0 sm:$0xff]  ;;  %v2483_v11 = vld [vmem:[%s2820_s3 + $0x14] sm:$0xf0]  ;;  %s3241_s28 = sld [smem:[#allocation13_spill]] (!%p2444_p7) }
 0x35c   : > { %2583 = vrcp.f32 %v1315_v18 }
 0x35d   : > { %v1345_v23 = vpack.c.bf16 %v1337_v20, %v1337_v20 }
 0x35f   : > { %1587 = vmatpush.bf16.msrb.mxu1 %v2477_v12  ;;  %v2482_v12 = vld [vmem:[%s2820_s3 + $0x14] sm:$0xf] }
 0x362   : > { %v2584_v21 = vpop.eup %2583 }
 0x363   : > { %v1335_v22 = vmul.f32 %v2584_v21, %v2568_v49  ;;  %v1318_v36 = vpop.xlane.xlu2 %1317  ;;  %1588 = vmatpush.bf16.msrb.mxu1 %v2476_v13  ;;  %v2360_v13 = vld [vmem:[%s2820_s3 + $0x18] sm:$0xf0] }
 0x364   : > { %2585 = vrcp.f32 %v1318_v36  ;;  %v2492_v36 = vld [vmem:[%s2820_s3 + $0x64] sm:$0xf] }
 0x365   : > { %v1343_v24 = vpack.c.bf16 %v1335_v22, %v1335_v22 }
 0x366   : > { %2330 = vmatmul.msk.bf16.vlgmr.msrb.gmra.mxu0 %vm1249_vm9, %v1345_v23 }
 0x367   : > { %2328 = vmatmul.msk.bf16.vlgmr.msrb.gmra.mxu2 %vm1249_vm9, %v1343_v24 }
 0x36a   : > { %v2586_v38 = vpop.eup %2585 }
 0x36b   : > { %v1336_v40 = vmul.f32 %v2586_v38, %v2995_v54  ;;  %v2400_v38 = vld [vmem:[%s2820_s3 + $0x68] sm:$0xf0] }
 0x36c   : > { %v1362_v25 = vpop.f32.mrf.mxu1 }
 0x36d   : > { %v1499_v27 = vpack.c.bf16 %v1362_v25, %v1362_v25  ;;  %v1344_v45 = vpack.c.bf16 %v1336_v40, %v1336_v40  ;;  %v2390_v40 = vld [vmem:[%s2820_s3 + $0x50] sm:$0xf] }
 0x36f   : > { %v3015_v31 = vunpack.c.l.b16 %v1499_v27 }
 0x374   : > { %v1364_v28 = vpop.f32.mrf.mxu1 }
 0x375   : > { %v1381_v29 = vpop.f32.mrf.mxu2  ;;  %v2406_v28 = vld [vmem:[%s2820_s3 + $0x70] sm:$0xf] }
 0x376   : > { %v1500_v30 = vpack.c.bf16 %v1381_v29, %v1381_v29  ;;  %v2495_v29 = vld [vmem:[%s2820_s3 + $0x74] sm:$0xf0] }
 0x378   : > { %v3017_v32 = vunpack.c.l.b16 %v1500_v30  ;;  %v2494_v30 = vld [vmem:[%s2820_s3 + $0x74] sm:$0xf] }
 0x37a   : > { %v1511_v33 = vpack.c.b16 %v3017_v32, %v3015_v31  ;;  %v2407_v31 = vor.u32 %v2495_v29, %v2406_v28  ;;  %v2408_v32 = vld [vmem:[%s2820_s3 + $0x78] sm:$0xf0] }
 0x37c   : > { %1758 = vmatpush.bf16.msra.mxu2 %v2407_v31 }
 0x37d   : > { %v1383_v35 = vpop.f32.mrf.mxu2 }
 0x37e   : > { %v2493_v35 = vld [vmem:[%s2820_s3 + $0x64] sm:$0xf0] }
 0x38d   : > { %v1312_v37 = vpop.xlane.xlu2 %1311 }
 0x38e   : > { %2587 = vrcp.f32 %v1312_v37 }
 0x394   : > { %v2588_v39 = vpop.eup %2587 }
 0x395   : > { %v1334_v41 = vmul.f32 %v2588_v39, %v2576_v0  ;;  %v1085_v42 = vpop.permute.xlu2 %1084  ;;  %v2403_v39 = vor.u32 %v2492_v36, %v2400_v38  ;;  %v2501_v36 = vld [vmem:[%s2832_s14 + $0x28] sm:$0xff]  ;;  %v2500_v38 = vld [vmem:[%s2832_s14 + $0x20] sm:$0xff] }
 0x396   : > { %v1465_v43 = vsel %vm1349_vm8, %v1085_v42, 0  ;;  %v2490_v42 = vld [vmem:[%s2820_s3 + $0x54] sm:$0xf] }
 0x397   : > { %v1342_v44 = vpack.c.bf16 %v1334_v41, %v1334_v41  ;;  %1474 = vmatpush.bf16.msrb.mxu3 %v1465_v43  ;;  %v2491_v41 = vld [vmem:[%s2820_s3 + $0x54] sm:$0xf0] }
 0x398   : > { %v2391_v43 = vor.u32 %v2491_v41, %v2390_v40 }
 0x399   : > { %2327 = vmatmul.msk.bf16.vlgmr.msra.gmra.mxu1 %vm1249_vm9, %v1342_v44  ;;  %v2392_v44 = vld [vmem:[%s2820_s3 + $0x58] sm:$0xf0] }
 0x39a   : > { %2329 = vmatmul.msk.bf16.vlgmr.msrb.gmra.mxu3 %vm1249_vm9, %v1344_v45  ;;  %v2395_v45 = vor.u32 %v2490_v42, %v2392_v44 }
 0x3c0   : > { %v1400_v46 = vpop.f32.mrf.mxu3 }
 0x3c1   : > { %v1501_v48 = vpack.c.bf16 %v1400_v46, %v1400_v46  ;;  %v2382_v46 = vld [vmem:[%s2820_s3 + $0x40] sm:$0xf] }
 0x3c3   : > { %v1514_v51 = vunpack.c.l.b16 %v1501_v48  ;;  %v2488_v48 = vld [vmem:[%s2820_s3 + $0x44] sm:$0xf] }
 0x3c8   : > { %v1402_v47 = vpop.f32.mrf.mxu3 }
 0x3c9   : > { %v2489_v47 = vld [vmem:[%s2820_s3 + $0x44] sm:$0xf0] }
 0x3d3   : > { %v1419_v49 = vpop.f32.mrf.mxu0 }
 0x3d4   : > { %v1502_v50 = vpack.c.bf16 %v1419_v49, %v1419_v49  ;;  %v2383_v49 = vor.u32 %v2489_v47, %v2382_v46 }
 0x3d6   : > { %v1515_v52 = vunpack.c.l.b16 %v1502_v50  ;;  %v2384_v50 = vld [vmem:[%s2820_s3 + $0x48] sm:$0xf0] }
 0x3d8   : > { %v1516_v53 = vpack.c.b16 %v1515_v52, %v1514_v51  ;;  %v2387_v52 = vor.u32 %v2488_v48, %v2384_v50  ;;  %v2550_v48 = vld [vmem:[%s731_s0] ss:$0 sm:$0xff]  ;;  %s3243_s0 = sld [smem:[#allocation15_spill]] (!%p2444_p7) }
 0x3da   : > { %1517 = vrot.lane.b32.xlu1 %v1516_v53, %s2659_s25 }
 0x3db   : > { %v1421_v54 = vpop.f32.mrf.mxu0 }
 0x3e3   : > { %v1495_v55 = vpop.f32.mrf.mxu0 }
 0x3e4   : > { %v1506_v0 = vpack.c.bf16 %v1495_v55, %v1495_v55  ;;  %v2374_v55 = vld [vmem:[%s2820_s3 + $0x30] sm:$0xf] }
 0x3e6   : > { %v1529_v6 = vunpack.c.l.b16 %v1506_v0  ;;  %v2485_v0 = vld [vmem:[%s2820_s3 + $0x24] sm:$0xf0] }
 0x3ea   : > { %v1457_v56 = vpop.f32.mrf.mxu2 }
 0x3eb   : > { %v1497_v57 = vpop.f32.mrf.mxu0  ;;  %v1504_v59 = vpack.c.bf16 %v1457_v56, %v1457_v56  ;;  %v2487_v56 = vld [vmem:[%s2820_s3 + $0x34] sm:$0xf0] }
 0x3ec   : > { %v2486_v57 = vld [vmem:[%s2820_s3 + $0x34] sm:$0xf] }
 0x3ed   : > { %v1522_v61 = vunpack.c.l.b16 %v1504_v59 }
 0x3f2   : > { %v1459_v58 = vpop.f32.mrf.mxu2 }
 0x416   : > { %v1438_v26 = vpop.f32.mrf.mxu1 }
 0x417   : > { %v1503_v60 = vpack.c.bf16 %v1438_v26, %v1438_v26  ;;  %v2375_v26 = vor.u32 %v2487_v56, %v2374_v55 }
 0x419   : > { %v1521_v62 = vunpack.c.l.b16 %v1503_v60  ;;  %v2376_v60 = vld [vmem:[%s2820_s3 + $0x38] sm:$0xf0] }
 0x41b   : > { %v1523_v63 = vpack.c.b16 %v1522_v61, %v1521_v62  ;;  %v2379_v61 = vor.u32 %v2486_v57, %v2376_v60  ;;  %v2497_v60 = vld [vmem:[%s2832_s14 + $0x8] sm:$0xff] }
 0x41d   : > { %1524 = vrot.lane.b32.xlu2 %v1523_v63, %s2660_s22  ;;  %v1476_v1 = vpop.f32.mrf.mxu3  ;;  %v2366_v63 = vld [vmem:[%s2820_s3 + $0x20] sm:$0xf] }
 0x41e   : > { %v1505_v2 = vpack.c.bf16 %v1476_v1, %v1476_v1  ;;  %v1440_v4 = vpop.f32.mrf.mxu1  ;;  %v2484_v1 = vld [vmem:[%s2820_s3 + $0x24] sm:$0xf] }
 0x41f   : > { %v2367_v4 = vor.u32 %v2485_v0, %v2366_v63 }
 0x420   : > { %v1528_v7 = vunpack.c.l.b16 %v1505_v2 }
 0x422   : > { %v1530_v8 = vpack.c.b16 %v1529_v6, %v1528_v7  ;;  %v2368_v6 = vld [vmem:[%s2820_s3 + $0x28] sm:$0xf0] }
 0x424   : > { %1531 = vrot.lane.b32.xlu1 %v1530_v8, %s2661_s26  ;;  %v2371_v8 = vor.u32 %v2484_v1, %v2368_v6 }
 0x425   : > { %v1478_v9 = vpop.f32.mrf.mxu3 }
 0x44c   : > { %v1518_v14 = vpop.permute.xlu1 %1517 }
 0x44d   : > { %v1535_v15 = vsel %vm1088_vm7, %v1511_v33, %v1518_v14  ;;  %v2411_v33 = vor.u32 %v2494_v30, %v2408_v32  ;;  %v2350_v14 = vld [vmem:[%s2820_s3] sm:$0xf]  ;;  %v2503_v30 = vld [vmem:[%s2832_s14 + $0x38] sm:$0xff] }
 0x44e   : > { %1859 = vmatpush.bf16.msra.mxu0 %v2503_v30 }
 0x44f   : > { %1772 = vmatpush.bf16.msra.mxu3 %v2411_v33  ;;  %v2502_v33 = vld [vmem:[%s2832_s14 + $0x30] sm:$0xff] }
 0x452   : > { %1860 = vmatpush.bf16.msra.mxu0 %v2502_v33 }
 0x453   : > { %1773 = vmatpush.bf16.msra.mxu3 %v2403_v39 }
 0x456   : > { %1861 = vmatpush.bf16.msra.mxu0 %v2501_v36 }
 0x457   : > { %1774 = vmatpush.bf16.msra.mxu3 %v2395_v45 }
 0x45a   : > { %1862 = vmatpush.bf16.msra.mxu0 %v2500_v38 }
 0x45b   : > { %1775 = vmatpush.bf16.msra.mxu3 %v2387_v52 }
 0x45f   : > { %1776 = vmatpush.bf16.msra.mxu3 %v2379_v61  ;;  %v2496_v61 = vld [vmem:[%s2832_s14] sm:$0xff] }
 0x463   : > { %1777 = vmatpush.bf16.msra.mxu3 %v2371_v8 }
 0x477   : > { %v1525_v34 = vpop.permute.xlu2 %1524 }
 0x478   : > { %v1538_v16 = vsel %vm1536_vm10, %v1535_v15, %v1525_v34  ;;  %v2481_v34 = vld [vmem:[%s2820_s3 + $0x4] sm:$0xf0]  ;;  %v2359_v15 = vor.u32 %v2483_v11, %v2358_v10 }
 0x496   : > { %v1532_v17 = vpop.permute.xlu1 %1531 }
 0x497   : > { %v1541_v18 = vsel %vm1539_vm11, %v1538_v16, %v1532_v17  ;;  %v2363_v16 = vor.u32 %v2482_v12, %v2360_v13  ;;  %v2480_v17 = vld [vmem:[%s2820_s3 + $0x4] sm:$0xf] }
 0x498   : > { %2347 = vmatmul.msk.bf16.vlgmr.msrb.gmra.mxu1 %vm1578_vm12, %v1541_v18  ;;  %v2352_v18 = vld [vmem:[%s2820_s3 + $0x8] sm:$0xf0] }
 0x499   : > { %1778 = vmatpush.bf16.msra.mxu3 %v2363_v16 }
 0x515   : > { %v1590_v20 = vpop.f32.mrf.mxu1 }
 0x516   : > { %v1591_v21 = vadd.f32 %v2549_v19, %v1590_v20  ;;  %v2351_v20 = vor.u32 %v2481_v34, %v2350_v14 }
 0x518   : > { %v3039_v22 = vadd.f32 %v1591_v21, %v2842_v3  ;;  %v2355_v21 = vor.u32 %v2480_v17, %v2352_v18 }
 0x51a   : > { %1599 = vadd.xlane.f32.xlu2 %v3039_v22  ;;  %v1605_v23 = vmul.f32 %v3039_v22, %v3039_v22  ;;  %1779 = vmatpush.bf16.msra.mxu3 %v2355_v21 }
 0x51c   : > { %1607 = vadd.xlane.f32.xlu1 %v1605_v23 }
 0x51d   : > { %v1592_v24 = vpop.f32.mrf.mxu1 }
 0x51e   : > { %v1593_v25 = vadd.f32 %v2549_v19, %v1592_v24 }
 0x520   : > { %v3045_v27 = vadd.f32 %v1593_v25, %v2847_v5  ;;  %v2398_v5 = vld [vmem:[%s2820_s3 + $0x60] sm:$0xf] }
 0x521   : > { %v2399_v37 = vor.u32 %v2493_v35, %v2398_v5 }
 0x522   : > { %1601 = vadd.xlane.f32.xlu0 %v3045_v27  ;;  %v1606_v3 = vmul.f32 %v3045_v27, %v3045_v27 }
 0x523   : > { %1759 = vmatpush.bf16.msra.mxu2 %v2399_v37 }
 0x527   : > { %1760 = vmatpush.bf16.msra.mxu2 %v2391_v43 }
 0x52a   : > { %1609 = vadd.xlane.f32.xlu0 %v1606_v3 }
 0x52b   : > { %1761 = vmatpush.bf16.msra.mxu2 %v2383_v49 }
 0x52f   : > { %1762 = vmatpush.bf16.msra.mxu2 %v2375_v26  ;;  %v2498_v26 = vld [vmem:[%s2832_s14 + $0x10] sm:$0xff] }
 0x533   : > { %1763 = vmatpush.bf16.msra.mxu2 %v2367_v4 }
 0x537   : > { %1764 = vmatpush.bf16.msra.mxu2 %v2359_v15  ;;  %v2552_v15 = vld [vmem:[%s751_s5] ss:$0 sm:$0xff] }
 0x53b   : > { %1765 = vmatpush.bf16.msra.mxu2 %v2351_v20 }
 0x58d   : > { %v1600_v51 = vpop.xlane.xlu2 %1599 }
 0x58e   : > { %v3066_v53 = vmul.f32 0.015625, %v1600_v51 }
 0x58f   : > { %v1608_v54 = vpop.xlane.xlu1 %1607 }
 0x590   : > { %v1613_v58 = vmul.f32 %v3066_v53, %v3066_v53  ;;  %v1611_v59 = vmul.f32 0.015625, %v1608_v54  ;;  %v1619_v45 = vsub.f32 %v3039_v22, %v3066_v53  ;;  %v2551_v54 = vld [vmem:[%s3240_s13] ss:$0 sm:$0xff] }
 0x592   : > { %v1615_v62 = vsub.f32 %v1611_v59, %v1613_v58  ;;  %v2499_v59 = vld [vmem:[%s2832_s14 + $0x18] sm:$0xff] }
 0x593   : > { %1863 = vmatpush.bf16.msra.mxu0 %v2499_v59 }
 0x594   : > { %v1617_v2 = vmax.f32 %v1615_v62, 0.0  ;;  %v1672_v62 = vld [vmem:[%s2826_s27] sm:$0x3] }
 0x595   : > { %v1602_v7 = vpop.xlane.xlu0 %1601  ;;  %v1675_v1 = vperm.slane %v1672_v62, 1  ;;  %v1674_v4 = vperm.slane %v1672_v62, 0 }
 0x596   : > { %v1621_v9 = vadd.f32 1e-05, %v1617_v2  ;;  %v1604_v19 = vmul.f32 0.015625, %v1602_v7 }
 0x597   : > { %1864 = vmatpush.bf16.msra.mxu0 %v2498_v26 }
 0x598   : > { %2589 = vrsqrt.f32 %v1621_v9  ;;  %v1614_v25 = vmul.f32 %v1604_v19, %v1604_v19  ;;  %vm1629_vm14 = vweird.f32 %v1621_v9  ;;  %v1620_v50 = vsub.f32 %v3045_v27, %v1604_v19 }
 0x59b   : > { %1865 = vmatpush.bf16.msra.mxu0 %v2497_v60 }
 0x59d   : > { %v1610_v23 = vpop.xlane.xlu0 %1609 }
 0x59e   : > { %v2590_v24 = vpop.eup %2589  ;;  %v1612_v3 = vmul.f32 0.015625, %v1610_v23 }
 0x59f   : > { %v1624_v28 = vmul.f32 %v2590_v24, %v1621_v9  ;;  %vm1630_vm13 = vweird.f32 %v2590_v24  ;;  %1866 = vmatpush.bf16.msra.mxu0 %v2496_v61 }
 0x5a0   : > { %v1616_v29 = vsub.f32 %v1612_v3, %v1614_v25  ;;  %vm1631_vm15 = vmor %vm1629_vm14, %vm1630_vm13 }
 0x5a1   : > { %v1625_v31 = vmul.f32 %v2590_v24, %v1624_v28 }
 0x5a2   : > { %v1618_v32 = vmax.f32 %v1616_v29, 0.0 }
 0x5a3   : > { %v1626_v35 = vmul.f32 0.5, %v1625_v31 }
 0x5a4   : > { %v1622_v5 = vadd.f32 1e-05, %v1618_v32 }
 0x5a5   : > { %v1627_v37 = vsub.f32 1.5, %v1626_v35 }
 0x5a6   : > { %2591 = vrsqrt.f32 %v1622_v5  ;;  %vm1639_vm1 = vweird.f32 %v1622_v5 }
 0x5a7   : > { %v1628_v40 = vmul.f32 %v2590_v24, %v1627_v37 }
 0x5a9   : > { %v1632_v43 = vsel %vm1631_vm15, %v2590_v24, %v1628_v40 }
 0x5aa   : > { %v1643_v47 = vmul.f32 %v1632_v43, %v1619_v45 }
 0x5ac   : > { %v2592_v39 = vpop.eup %2591  ;;  %v1648_v53 = vmul.f32 %v2550_v48, %v1643_v47 }
 0x5ad   : > { %v1634_v41 = vmul.f32 %v2592_v39, %v1622_v5  ;;  %vm1640_vm0 = vweird.f32 %v2592_v39 }
 0x5ae   : > { %vm1641_vm2 = vmor %vm1639_vm1, %vm1640_vm0  ;;  %v1653_v56 = vadd.f32 %v2551_v54, %v1648_v53 }
 0x5af   : > { %v1635_v42 = vmul.f32 %v2592_v39, %v1634_v41 }
 0x5b1   : > { %v1636_v44 = vmul.f32 0.5, %v1635_v42 }
 0x5b3   : > { %v1637_v46 = vsub.f32 1.5, %v1636_v44 }
 0x5b5   : > { %v1638_v49 = vmul.f32 %v2592_v39, %v1637_v46 }
 0x5b7   : > { %v1642_v51 = vsel %vm1641_vm2, %v2592_v39, %v1638_v49 }
 0x5b8   : > { %v1644_v52 = vmul.f32 %v1642_v51, %v1620_v50 }
 0x5ba   : > { %v1649_v55 = vmul.f32 %v2550_v48, %v1644_v52 }
 0x5bc   : > { %v1654_v57 = vadd.f32 %v2551_v54, %v1649_v55 }
 0x5be   : > { %v1655_v58 = vpack.c.bf16 %v1654_v57, %v1653_v56 }
 0x5c0   : > { %1766 = vmatmul.bf16.vlgmr.msra.gmra.mxu2 %v1655_v58  ;;  %1780 = vmatmul.bf16.vlgmr.msra.gmra.mxu3 %v1655_v58 }
 0x643   : > { %v1767_v63 = vpop.f32.mrf.mxu2  ;;  %v1781_v0 = vpop.f32.mrf.mxu3 }
 0x644   : > { %v1782_v2 = vadd.f32 %v1781_v0, %v1675_v1  ;;  %v1768_v10 = vadd.f32 %v1767_v63, %v1674_v4 }
 0x646   : > { %v1786_v8 = vmax.f32 %v1782_v2, 0.0 }
 0x648   : > { %v1788_v13 = vmul.f32 %v1786_v8, %v1768_v10 }
 0x64b   : > { %v1769_v6 = vpop.f32.mrf.mxu2  ;;  %v1783_v7 = vpop.f32.mrf.mxu3 }
 0x64c   : > { %v1784_v9 = vadd.f32 %v1783_v7, %v1675_v1  ;;  %v1770_v11 = vadd.f32 %v1769_v6, %v1674_v4 }
 0x64e   : > { %v1787_v12 = vmax.f32 %v1784_v9, 0.0 }
 0x650   : > { %v1789_v14 = vmul.f32 %v1787_v12, %v1770_v11 }
 0x652   : > { %v1790_v34 = vpack.c.bf16 %v1789_v14, %v1788_v13 }
 0x654   : > { %1867 = vmatmul.bf16.vlgmr.msra.gmra.mxu0 %v1790_v34 }
 0x6d1   : > { %v1868_v16 = vpop.f32.mrf.mxu0 }
 0x6d2   : > { %v1869_v17 = vadd.f32 %v2552_v15, %v1868_v16 }
 0x6d4   : > { %v3114_v18 = vadd.f32 %v1869_v17, %v3039_v22 }
 0x6d6   : > { %1875 = vst [vmem:[#allocation2] sm:$0xff] %v3114_v18 }
 0x6d9   : > { %v1870_v19 = vpop.f32.mrf.mxu0 }
 0x6da   : > { %v1871_v20 = vadd.f32 %v2552_v15, %v1870_v19  ;;  %1880 = sbr.rel (%p2444_p7) target bundleno = 2054 (0x806), region = 96 }
 0x6dc   : > { %v3118_v21 = vadd.f32 %v1871_v20, %v3045_v27 }
 0x6de   : > { %1876 = vst [vmem:[#allocation2 + $0x8] sm:$0xff] %v3118_v21 }
 0x6df   : > { %v1885_v23 = vrot.slane %v3118_v21, 7  ;;  %vm1892_vm3 = vcmask 1040384   ;;  %v1899_v24 = vmul.f32 %v3118_v21, %v3118_v21  ;;  %vm1888_vm4 = vcmask 1047559   ;;  %v1982_v30 = vld [vmem:[%s3216_s15 + $0x78] sm:$0xff]  ;;  %v1981_v31 = vld [vmem:[%s3216_s15 + $0x70] sm:$0xff]  ;;  %v1980_v32 = vld [vmem:[%s3216_s15 + $0x68] sm:$0xff] }
 0x6e0   : > { %v1898_v27 = vmul.f32 %v3114_v18, %v3114_v18  ;;  %v1889_v28 = vsel %vm1888_vm4, %v3114_v18, 0.0  ;;  %1994 = vmatpush.msra.mxu0 %v1982_v30  ;;  %v1979_v33 = vld [vmem:[%s3216_s15 + $0x60] sm:$0xff]  ;;  %v1978_v5 = vld [vmem:[%s3216_s15 + $0x58] sm:$0xff]  ;;  %v1977_v35 = vld [vmem:[%s3216_s15 + $0x50] sm:$0xff]  ;;  %vm1991_vm11 = vcmask 1041409  }
 0x6e1   : > { %v1893_v22 = vsel %vm1892_vm3, %v1885_v23, 0.0  ;;  %v1902_v25 = vrot.slane %v1899_v24, 7  ;;  %v1976_v36 = vld [vmem:[%s3216_s15 + $0x48] sm:$0xff]  ;;  %v1975_v37 = vld [vmem:[%s3216_s15 + $0x40] sm:$0xff]  ;;  %v1974_v40 = vld [vmem:[%s3216_s15 + $0x38] sm:$0xff] }
 0x6e2   : > { %1894 = vadd.xlane.f32.xlu0 %v1893_v22  ;;  %v1905_v29 = vsel %vm1888_vm4, %v1898_v27, 0.0  ;;  %1995 = vmatpush.msra.mxu0 %v1981_v31  ;;  %v1973_v44 = vld [vmem:[%s3216_s15 + $0x30] sm:$0xff]  ;;  %v1972_v46 = vld [vmem:[%s3216_s15 + $0x28] sm:$0xff]  ;;  %v1971_v47 = vld [vmem:[%s3216_s15 + $0x20] sm:$0xff] }
 0x6e3   : > { %v1908_v3 = vsel %vm1892_vm3, %v1902_v25, 0.0  ;;  %v1970_v49 = vld [vmem:[%s3216_s15 + $0x18] sm:$0xff]  ;;  %v1969_v53 = vld [vmem:[%s3216_s15 + $0x10] sm:$0xff]  ;;  %v1968_v56 = vld [vmem:[%s3216_s15 + $0x8] sm:$0xff] }
 0x6e4   : > { %1909 = vadd.xlane.f32.xlu1 %v1908_v3  ;;  %1996 = vmatpush.msra.mxu0 %v1980_v32  ;;  %v1967_v58 = vld [vmem:[%s3216_s15] sm:$0xff] }
 0x6e5   : > { %v2593_v12 = vld [vmem:[%s3241_s28] ss:$0 sm:$0xff] }
 0x6e6   : > { %1997 = vmatpush.msra.mxu0 %v1979_v33  ;;  %v2594_v16 = vld [vmem:[%s3242_s1] ss:$0 sm:$0xff] }
 0x6e7   : > { %v2595_v30 = vld [vmem:[%s3243_s0] ss:$0 sm:$0xff] }
 0x6e8   : > { %1998 = vmatpush.msra.mxu0 %v1978_v5 }
 0x6ea   : > { %1890 = vadd.xlane.f32.xlu0 %v1889_v28  ;;  %1999 = vmatpush.msra.mxu0 %v1977_v35 }
 0x6ec   : > { %1906 = vadd.xlane.f32.xlu1 %v1905_v29  ;;  %2000 = vmatpush.msra.mxu0 %v1976_v36 }
 0x6ee   : > { %2001 = vmatpush.msra.mxu0 %v1975_v37 }
 0x6f0   : > { %2002 = vmatpush.msra.mxu0 %v1974_v40 }
 0x6f2   : > { %2003 = vmatpush.msra.mxu0 %v1973_v44 }
 0x6f4   : > { %2004 = vmatpush.msra.mxu0 %v1972_v46 }
 0x6f6   : > { %2005 = vmatpush.msra.mxu0 %v1971_v47 }
 0x6f8   : > { %2006 = vmatpush.msra.mxu0 %v1970_v49 }
 0x6fa   : > { %2007 = vmatpush.msra.mxu0 %v1969_v53 }
 0x6fc   : > { %2008 = vmatpush.msra.mxu0 %v1968_v56 }
 0x6fe   : > { %2009 = vmatpush.msra.mxu0 %v1967_v58 }
 0x755   : > { %v1895_v38 = vpop.xlane.xlu0 %1894 }
 0x756   : > { %v1897_v39 = vmul.f32 0.015625, %v1895_v38 }
 0x757   : > { %v1910_v41 = vpop.xlane.xlu1 %1909 }
 0x758   : > { %v1914_v42 = vmul.f32 %v1897_v39, %v1897_v39  ;;  %v1912_v43 = vmul.f32 0.015625, %v1910_v41  ;;  %v1921_v2 = vrot.slane %v1897_v39, 1 }
 0x75a   : > { %v1916_v45 = vsub.f32 %v1912_v43, %v1914_v42  ;;  %v1925_v9 = vsub.f32 %v3118_v21, %v1921_v2 }
 0x75c   : > { %v1918_v48 = vmax.f32 %v1916_v45, 0.0 }
 0x75d   : > { %v1891_v50 = vpop.xlane.xlu0 %1890 }
 0x75e   : > { %v1927_v51 = vadd.f32 1e-05, %v1918_v48  ;;  %v1896_v52 = vmul.f32 0.015625, %v1891_v50 }
 0x75f   : > { %v1907_v54 = vpop.xlane.xlu1 %1906 }
 0x760   : > { %2596 = vrsqrt.f32 %v1927_v51  ;;  %v1913_v55 = vmul.f32 %v1896_v52, %v1896_v52  ;;  %v1911_v57 = vmul.f32 0.015625, %v1907_v54  ;;  %vm1944_vm6 = vweird.f32 %v1927_v51 }
 0x761   : > { %v1924_v19 = vsub.f32 %v3114_v18, %v1896_v52 }
 0x762   : > { %v1915_v59 = vsub.f32 %v1911_v57, %v1913_v55 }
 0x764   : > { %v1917_v26 = vmax.f32 %v1915_v59, 0.0 }
 0x766   : > { %v2597_v60 = vpop.eup %2596  ;;  %v1926_v62 = vadd.f32 1e-05, %v1917_v26 }
 0x767   : > { %v1939_v61 = vmul.f32 %v2597_v60, %v1927_v51  ;;  %vm1945_vm5 = vweird.f32 %v2597_v60 }
 0x768   : > { %2598 = vrsqrt.f32 %v1926_v62  ;;  %vm1946_vm7 = vmor %vm1944_vm6, %vm1945_vm5  ;;  %vm1934_vm9 = vweird.f32 %v1926_v62 }
 0x769   : > { %v1940_v63 = vmul.f32 %v2597_v60, %v1939_v61 }
 0x76b   : > { %v1941_v0 = vmul.f32 0.5, %v1940_v63 }
 0x76d   : > { %v1942_v1 = vsub.f32 1.5, %v1941_v0 }
 0x76e   : > { %v2599_v4 = vpop.eup %2598 }
 0x76f   : > { %v1943_v6 = vmul.f32 %v2597_v60, %v1942_v1  ;;  %v1929_v7 = vmul.f32 %v2599_v4, %v1926_v62  ;;  %vm1935_vm8 = vweird.f32 %v2599_v4 }
 0x770   : > { %vm1936_vm10 = vmor %vm1934_vm9, %vm1935_vm8 }
 0x771   : > { %v1947_v8 = vsel %vm1946_vm7, %v2597_v60, %v1943_v6  ;;  %v1930_v11 = vmul.f32 %v2599_v4, %v1929_v7 }
 0x772   : > { %v1950_v10 = vrot.slane %v1947_v8, 1 }
 0x773   : > { %v1931_v13 = vmul.f32 0.5, %v1930_v11 }
 0x774   : > { %v1954_v14 = vmul.f32 %v1950_v10, %v1925_v9 }
 0x775   : > { %v1932_v34 = vsub.f32 1.5, %v1931_v13 }
 0x776   : > { %v1959_v15 = vmul.f32 %v2593_v12, %v1954_v14 }
 0x777   : > { %v1933_v17 = vmul.f32 %v2599_v4, %v1932_v34 }
 0x778   : > { %v1964_v23 = vadd.f32 %v2594_v16, %v1959_v15 }
 0x779   : > { %v1937_v20 = vsel %vm1936_vm10, %v2599_v4, %v1933_v17 }
 0x77a   : > { %v1953_v21 = vmul.f32 %v1937_v20, %v1924_v19  ;;  %v1966_v25 = vmax.f32 %v1964_v23, 0.0 }
 0x77c   : > { %v1958_v24 = vmul.f32 %v2593_v12, %v1953_v21  ;;  %v1990_v28 = vrot.slane %v1966_v25, 6 }
 0x77e   : > { %v1963_v22 = vadd.f32 %v2594_v16, %v1958_v24 }
 0x780   : > { %v1965_v3 = vmax.f32 %v1963_v22, 0.0 }
 0x782   : > { %v1989_v27 = vrot.slane %v1965_v3, 7 }
 0x784   : > { %v1992_v29 = vsel %vm1991_vm11, %v1990_v28, %v1989_v27 }
 0x785   : > { %2010 = vmatmul.f32.vlgmr.msra.gmra.mxu0 %v1992_v29 }
 0x802   : > { %v2011_v31 = vpop.f32.mrf.mxu0 }
 0x803   : > { %v2012_v32 = vadd.f32 %v2595_v30, %v2011_v31 }
 0x805   : > { %2014 = vst [vmem:[#allocation3] sm:$0x3] %v2012_v32 }
 0x806 PF: > { %s3244_s14 = sld [smem:[#allocation7_spill]]  ;;  %s2662_s30 = smov [#allocation3]  }
 0x807   : > { %s3246_s27 = sld [smem:[#allocation16_spill]]  ;;  %s2023_s17 = sshll.u32 %s2662_s30, 4  ;;  %s2024_s17 = int_to_ptr.vmem [resolvable:$true] %s2023_s17 }
 0x80c   : > { %s3245_s5 = sadd.s32 4294967295, %s3244_s14  }
 0x80d   : > { %p2514_p8 = scmp.eq.s32.totalorder %s3245_s5, 1  ;;  %s2025_s23 = sshll.u32 %s3246_s27, 4  ;;  %s2026_s23 = int_to_ptr.hbm [resolvable:$true] %s2025_s23 }
 0x80f   : > { %2511 = dma.vmem_to_hbm [thread:$0]  (%p2514_p8), %s2024_s17, 32, %s2026_s23, [#allocation4]  }
 0x810   : > { %2641 = dma.done.wait (%p2514_p8), [#allocation4], 32  }
 0x811   : > { %2643 = vsyncadd (%p2514_p8), [#allocation4], 4294967264 }
 0x812 PF: > { %s3247_s21 = sld [smem:[#allocation7_spill]] }
 0x813   : > { %s3248_s24 = sld [smem:[#allocation6_spill]] }
 0x814   : > { %s3249_s25 = sld [smem:[#allocation8_spill]] }
 0x818   : > { %s28_s26 = sadd.s32 1, %s3247_s21  }
 0x819   : > { %p25_p9 = scmp.ge.s32.totalorder %s28_s26, 4  }
 0x81b   :  { %27 = sbr.rel (!%p25_p9) target bundleno = 11 (0xb), region = 160 }
 0x820   :  { %2039 = vsyncpa [#allocation4], 1 }
 0x821   :  { %2041 = vsyncpa [#allocation4 + $0x1], 1 }

</bundles_post_ra>
